<compile_context>
chip_gen: v7x
topology: tpu7x:2x2x1
jax: 0.10.0
libtpu: 0.0.40
codegen_flags: <defaults>
</compile_context>

<pallas_src>
import math
import functools

import jax
import jax.numpy as jnp
from jax.experimental import pallas as pl
from jax.experimental.pallas import tpu as pltpu

EPS_BN = 1e-5


# ---------------------------------------------------------------------------
# Fused kernel: L x (GCNConv + BatchNorm1d [+ ReLU]) + mean pool + head
# ---------------------------------------------------------------------------
def fused_gcn_kernel(a_ref, h0_ref, batch_ref, esum_ref, w_ref, gamma_ref,
                     beta_ref, wf_ref, bf_ref, w1_ref, b1_ref, w2_ref, b2_ref,
                     feat_ref, pred_ref, h_scr, *, num_layers, num_graphs):
    layer = pl.program_id(0)

    @pl.when(layer == 0)
    def _init():
        h_scr[...] = h0_ref[...]

    # ---- GCNConv: node transform + add-aggregation (bf16 MXU, f32 acc) ----
    xw = jnp.dot(h_scr[...].astype(jnp.bfloat16), w_ref[0],
                 preferred_element_type=jnp.float32)
    agg = jnp.dot(a_ref[...], xw.astype(jnp.bfloat16),
                  preferred_element_type=jnp.float32)
    # edge-embedding contribution per destination node.  (GCNConv bias is a
    # per-column constant -> exactly cancelled by the BN mean subtraction.)
    agg = agg + esum_ref[0]

    # ---- BatchNorm1d, training mode (biased batch statistics), f32 --------
    mean = jnp.mean(agg, axis=0, keepdims=True)
    var = jnp.mean((agg - mean) ** 2, axis=0, keepdims=True)
    hn = (agg - mean) * jax.lax.rsqrt(var + EPS_BN)
    hn = hn * gamma_ref[0] + beta_ref[0]

    # ReLU on all but the last layer; dropout(p=0) is the identity.
    not_last = layer < num_layers - 1

    @pl.when(not_last)
    def _relu():
        h_scr[...] = jnp.maximum(hn, 0.0)

    @pl.when(jnp.logical_not(not_last))
    def _no_relu():
        h_scr[...] = hn

    # ---- epilogue on the last layer: mean pool + feat_lin + pred_head -----
    @pl.when(layer == num_layers - 1)
    def _head():
        n = h_scr.shape[0]
        # one-hot pooling matrix built in-register from per-node graph ids
        onehot = (batch_ref[...] ==
                  jax.lax.broadcasted_iota(jnp.int32, (num_graphs, n), 0)
                  ).astype(jnp.float32)
        counts = jnp.sum(onehot, axis=1, keepdims=True)
        pooled = jnp.dot(onehot, h_scr[...],
                         preferred_element_type=jnp.float32)
        pooled = pooled / jnp.maximum(counts, 1.0)
        feat = jnp.dot(pooled, wf_ref[...],
                       preferred_element_type=jnp.float32) + bf_ref[...]
        z = jnp.dot(feat, w1_ref[...],
                    preferred_element_type=jnp.float32) + b1_ref[...]
        # Softplus (beta=1, threshold=20, matching torch.nn.Softplus)
        sp = jnp.where(z > 20.0, z,
                       jnp.log(1.0 + jnp.exp(jnp.minimum(z, 20.0))))
        pred = jnp.dot(sp, w2_ref[...],
                       preferred_element_type=jnp.float32) + b2_ref[...]
        feat_ref[...] = feat
        pred_ref[...] = pred


# ---------------------------------------------------------------------------
# Full forward (gather/scatter glue in JAX; everything else in ONE kernel)
# ---------------------------------------------------------------------------
def gcn_forward(params, x_idx, edge_index, edge_attr, batch, num_graphs):
    n = x_idx.shape[0]
    num_layers, d, _ = params["gcn_W"].shape
    feat_dim = params["feat_W"].shape[1]
    half = params["pred_W1"].shape[1]
    out_dim = params["pred_W2"].shape[1]

    # node embeddings (gather glue)
    h0 = (params["x_emb1"][x_idx[:, 0]] +
          params["x_emb2"][x_idx[:, 1]]).astype(jnp.float32)

    # edges with self loops appended (self-loop attr = (bond_type=5, dir=0))
    src, dst = edge_index[0], edge_index[1]
    loop = jnp.arange(n, dtype=src.dtype)
    src_full = jnp.concatenate([src, loop])
    dst_full = jnp.concatenate([dst, loop])

    # dense add-aggregation operator A[dst, src] += 1 (flow source->target),
    # bf16, DMA'd once and resident in VMEM for all layers inside the kernel.
    a = jnp.zeros((n, n), jnp.float32).at[dst_full, src_full].add(1.0)
    a = a.astype(jnp.bfloat16)

    # all layers' edge-embedding sums with ONE scatter -> (L, N, 1)
    e1, e2 = params["e_emb1"], params["e_emb2"]            # (L,6,1), (L,3,1)
    emb_edges = e1[:, edge_attr[:, 0], 0] + e2[:, edge_attr[:, 1], 0]  # (L,E)
    emb_loop = jnp.broadcast_to((e1[:, 5, 0] + e2[:, 0, 0])[:, None],
                                (num_layers, n))                       # (L,N)
    emb_all = jnp.concatenate([emb_edges, emb_loop], axis=1)         # (L,E+N)
    esum = jnp.zeros((n, num_layers), jnp.float32).at[dst_full].add(emb_all.T)
    esum = jnp.transpose(esum)[:, :, None]                           # (L,N,1)

    batch2d = batch.astype(jnp.int32)[None, :]                       # (1, N)
    w_all = params["gcn_W"].astype(jnp.bfloat16)

    kern = functools.partial(fused_gcn_kernel,
                             num_layers=num_layers, num_graphs=num_graphs)

    args = (a, h0, batch2d, esum, w_all,
            params["bn_g"], params["bn_b"],
            params["feat_W"], params["feat_b"],
            params["pred_W1"], params["pred_b1"],
            params["pred_W2"], params["pred_b2"])

    flops = (num_layers * (2 * n * d * d + 2 * n * n * d)
             + 2 * num_graphs * n * d
             + 2 * num_graphs * d * feat_dim
             + 2 * num_graphs * feat_dim * half
             + 2 * num_graphs * half * out_dim)
    bytes_accessed = int(sum(int(x.size) * x.dtype.itemsize for x in args)
                         + num_graphs * (feat_dim + out_dim) * 4)

    grid_spec = pltpu.PrefetchScalarGridSpec(
        num_scalar_prefetch=0,
        grid=(num_layers,),
        in_specs=[
            pl.BlockSpec((n, n), lambda l: (0, 0)),            # A (bf16)
            pl.BlockSpec((n, d), lambda l: (0, 0)),            # h0
            pl.BlockSpec((1, n), lambda l: (0, 0)),            # batch ids
            pl.BlockSpec((1, n, 1), lambda l: (l, 0, 0)),      # esum (L,N,1)
            pl.BlockSpec((1, d, d), lambda l: (l, 0, 0)),      # gcn W (bf16)
            pl.BlockSpec((1, 1, d), lambda l: (l, 0, 0)),      # bn gamma
            pl.BlockSpec((1, 1, d), lambda l: (l, 0, 0)),      # bn beta
            pl.BlockSpec((d, feat_dim), lambda l: (0, 0)),     # feat_W
            pl.BlockSpec((1, feat_dim), lambda l: (0, 0)),     # feat_b
            pl.BlockSpec((feat_dim, half), lambda l: (0, 0)),  # pred_W1
            pl.BlockSpec((1, half), lambda l: (0, 0)),         # pred_b1
            pl.BlockSpec((half, out_dim), lambda l: (0, 0)),   # pred_W2
            pl.BlockSpec((1, out_dim), lambda l: (0, 0)),      # pred_b2
        ],
        out_specs=(
            pl.BlockSpec((num_graphs, feat_dim), lambda l: (0, 0)),
            pl.BlockSpec((num_graphs, out_dim), lambda l: (0, 0)),
        ),
        scratch_shapes=[pltpu.VMEM((n, d), jnp.float32)],
    )

    feat, pred = pl.pallas_call(
        kern,
        grid_spec=grid_spec,
        out_shape=(jax.ShapeDtypeStruct((num_graphs, feat_dim), jnp.float32),
                   jax.ShapeDtypeStruct((num_graphs, out_dim), jnp.float32)),
        compiler_params=pltpu.CompilerParams(
            dimension_semantics=("arbitrary",),   # layers are sequential
            vmem_limit_bytes=64 * 1024 * 1024),
        cost_estimate=pl.CostEstimate(
            flops=flops,
            transcendentals=num_graphs * half + num_layers * d,
            bytes_accessed=bytes_accessed),
    )(*args)
    return feat, pred


# ---------------------------------------------------------------------------
# Deterministic parameter construction + example run
# ---------------------------------------------------------------------------
if __name__ == "__main__":
    num_atom_type = 119
    num_chirality_tag = 3
    num_bond_type = 6
    num_bond_direction = 3

    num_layer = 3
    emb_dim = 128
    feat_dim = 128
    N, E, G = 16, 24, 2   # nodes, directed edges, graphs (small test shapes)

    key = jax.random.PRNGKey(0)
    keys = iter(jax.random.split(key, 32))

    def xavier_uniform(kk, shape):
        a = math.sqrt(6.0 / (shape[0] + shape[1]))
        return jax.random.uniform(kk, shape, jnp.float32, -a, a)

    def linear_init(kk, fan_in, fan_out):
        k1, k2 = jax.random.split(kk)
        bound = 1.0 / math.sqrt(fan_in)
        w = jax.random.uniform(k1, (fan_in, fan_out), jnp.float32, -bound, bound)
        b = jax.random.uniform(k2, (1, fan_out), jnp.float32, -bound, bound)
        return w, b

    stdv = math.sqrt(6.0 / (emb_dim + emb_dim))
    gcn_W, e1s, e2s, bng, bnb = [], [], [], [], []
    for _ in range(num_layer):
        gcn_W.append(jax.random.uniform(
            next(keys), (emb_dim, emb_dim), jnp.float32, -stdv, stdv))
        e1s.append(xavier_uniform(next(keys), (num_bond_type, 1)))
        e2s.append(xavier_uniform(next(keys), (num_bond_direction, 1)))
        bng.append(jnp.ones((1, emb_dim), jnp.float32))
        bnb.append(jnp.zeros((1, emb_dim), jnp.float32))
    # NOTE: the GCNConv bias (reference inits it to 0) is omitted: a per-column
    # constant is exactly cancelled by training-mode BatchNorm's mean
    # subtraction, so dropping it is bit-equivalent for this forward pass.

    params = {
        "x_emb1": xavier_uniform(next(keys), (num_atom_type, emb_dim)),
        "x_emb2": xavier_uniform(next(keys), (num_chirality_tag, emb_dim)),
        "gcn_W": jnp.stack(gcn_W),     # (L, D, D)
        "e_emb1": jnp.stack(e1s),      # (L, 6, 1)
        "e_emb2": jnp.stack(e2s),      # (L, 3, 1)
        "bn_g": jnp.stack(bng),        # (L, 1, D)
        "bn_b": jnp.stack(bnb),        # (L, 1, D)
    }
    params["feat_W"], params["feat_b"] = linear_init(next(keys), emb_dim, feat_dim)
    params["pred_W1"], params["pred_b1"] = linear_init(next(keys), feat_dim, feat_dim // 2)
    params["pred_W2"], params["pred_b2"] = linear_init(next(keys), feat_dim // 2, 2)

    # deterministic synthetic graph data (data.x, edge_index, edge_attr, batch)
    x_idx = jnp.stack([
        jax.random.randint(next(keys), (N,), 0, num_atom_type),
        jax.random.randint(next(keys), (N,), 0, num_chirality_tag)], axis=1)
    edge_index = jax.random.randint(next(keys), (2, E), 0, N)
    edge_attr = jnp.stack([
        jax.random.randint(next(keys), (E,), 0, num_bond_type),
        jax.random.randint(next(keys), (E,), 0, num_bond_direction)], axis=1)
    batch = jnp.concatenate([jnp.zeros((N // 2,), jnp.int32),
                             jnp.ones((N - N // 2,), jnp.int32)])

    feat, pred = gcn_forward(params, x_idx, edge_index, edge_attr, batch, G)
    jax.block_until_ready((feat, pred))
    assert feat.shape == (G, feat_dim) and pred.shape == (G, 2)
    assert bool(jnp.all(jnp.isfinite(feat))) and bool(jnp.all(jnp.isfinite(pred)))
    print("KERNEL_OK")
</pallas_src>

<mosaic_0001>
module attributes {stable_mosaic.version = 11 : i64} {
  func.func @fused_gcn_kernel(%arg0: i32, %arg1: memref<16x16xbf16, #tpu.memory_space<vmem>>, %arg2: memref<16x128xf32, #tpu.memory_space<vmem>>, %arg3: memref<1x16xi32, #tpu.memory_space<vmem>>, %arg4: memref<1x16x1xf32, #tpu.memory_space<vmem>>, %arg5: memref<1x128x128xbf16, #tpu.memory_space<vmem>>, %arg6: memref<1x1x128xf32, #tpu.memory_space<vmem>>, %arg7: memref<1x1x128xf32, #tpu.memory_space<vmem>>, %arg8: memref<128x128xf32, #tpu.memory_space<vmem>>, %arg9: memref<1x128xf32, #tpu.memory_space<vmem>>, %arg10: memref<128x64xf32, #tpu.memory_space<vmem>>, %arg11: memref<1x64xf32, #tpu.memory_space<vmem>>, %arg12: memref<64x2xf32, #tpu.memory_space<vmem>>, %arg13: memref<1x2xf32, #tpu.memory_space<vmem>>, %arg14: memref<2x128xf32, #tpu.memory_space<vmem>>, %arg15: memref<2x2xf32, #tpu.memory_space<vmem>>, %arg16: memref<16x128xf32, #tpu.memory_space<vmem>>) attributes {dimension_semantics = [#tpu.dimension_semantics<arbitrary>], iteration_bounds = array<i64: 3>, scalar_prefetch = 0 : i64, scratch_operands = 1 : i64, tpu.core_type = #tpu.core_type<tc>, window_params = [{pipeline_mode = #tpu.pipeline_mode<synchronous>, transform_indices = @transform_0, window_bounds = array<i64: 16, 16>}, {pipeline_mode = #tpu.pipeline_mode<synchronous>, transform_indices = @transform_1, window_bounds = array<i64: 16, 128>}, {pipeline_mode = #tpu.pipeline_mode<synchronous>, transform_indices = @transform_2, window_bounds = array<i64: 1, 16>}, {transform_indices = @transform_3, window_bounds = array<i64: 1, 16, 1>}, {transform_indices = @transform_4, window_bounds = array<i64: 1, 128, 128>}, {transform_indices = @transform_5, window_bounds = array<i64: 1, 1, 128>}, {transform_indices = @transform_6, window_bounds = array<i64: 1, 1, 128>}, {pipeline_mode = #tpu.pipeline_mode<synchronous>, transform_indices = @transform_7, window_bounds = array<i64: 128, 128>}, {pipeline_mode = #tpu.pipeline_mode<synchronous>, transform_indices = @transform_8, window_bounds = array<i64: 1, 128>}, {pipeline_mode = #tpu.pipeline_mode<synchronous>, transform_indices = @transform_9, window_bounds = array<i64: 128, 64>}, {pipeline_mode = #tpu.pipeline_mode<synchronous>, transform_indices = @transform_10, window_bounds = array<i64: 1, 64>}, {pipeline_mode = #tpu.pipeline_mode<synchronous>, transform_indices = @transform_11, window_bounds = array<i64: 64, 2>}, {pipeline_mode = #tpu.pipeline_mode<synchronous>, transform_indices = @transform_12, window_bounds = array<i64: 1, 2>}, {pipeline_mode = #tpu.pipeline_mode<synchronous>, transform_indices = @transform_13, window_bounds = array<i64: 2, 128>}, {pipeline_mode = #tpu.pipeline_mode<synchronous>, transform_indices = @transform_14, window_bounds = array<i64: 2, 2>}]} {
    %c0_i32 = arith.constant 0 : i32
    %0 = arith.cmpi eq, %arg0, %c0_i32 : i32
    %1 = arith.extui %0 : i1 to i32
    %c0_i32_0 = arith.constant 0 : i32
    %2 = arith.cmpi ne, %1, %c0_i32_0 : i32
    scf.if %2 {
      %c0_26 = arith.constant 0 : index
      %c0_27 = arith.constant 0 : index
      %50 = vector.load %arg2[%c0_26, %c0_27] : memref<16x128xf32, #tpu.memory_space<vmem>>, vector<16x128xf32>
      %c0_28 = arith.constant 0 : index
      %c0_29 = arith.constant 0 : index
      %51 = vector.load %arg16[%c0_28, %c0_29] : memref<16x128xf32, #tpu.memory_space<vmem>>, vector<16x128xf32>
      tpu.vector_store %arg16[%c0_28, %c0_29], %50 {strides = array<i32>} : memref<16x128xf32, #tpu.memory_space<vmem>>, vector<16x128xf32>,
    } else {
    }
    %c0 = arith.constant 0 : index
    %c0_1 = arith.constant 0 : index
    %3 = vector.load %arg16[%c0, %c0_1] : memref<16x128xf32, #tpu.memory_space<vmem>>, vector<16x128xf32>
    %4 = arith.truncf %3 : vector<16x128xf32> to vector<16x128xbf16>
    %c0_2 = arith.constant 0 : index
    %c0_3 = arith.constant 0 : index
    %c0_4 = arith.constant 0 : index
    %5 = vector.load %arg5[%c0_2, %c0_3, %c0_4] : memref<1x128x128xbf16, #tpu.memory_space<vmem>>, vector<1x128x128xbf16>
    %6 = vector.shape_cast %5 : vector<1x128x128xbf16> to vector<128x128xbf16>
    %cst = arith.constant dense<0.000000e+00> : vector<16x128xf32>
    %7 = tpu.matmul %4, %6, %cst {dimension_numbers = #tpu.dot_dimension_numbers<[1], [0], [0], [1], [0, 0, 1, 1], [], []>} : vector<16x128xbf16>, vector<128x128xbf16>, vector<16x128xf32> -> vector<16x128xf32>
    %c0_5 = arith.constant 0 : index
    %c0_6 = arith.constant 0 : index
    %8 = vector.load %arg1[%c0_5, %c0_6] : memref<16x16xbf16, #tpu.memory_space<vmem>>, vector<16x16xbf16>
    %9 = arith.truncf %7 : vector<16x128xf32> to vector<16x128xbf16>
    %cst_7 = arith.constant dense<0.000000e+00> : vector<16x128xf32>
    %10 = tpu.matmul %8, %9, %cst_7 {dimension_numbers = #tpu.dot_dimension_numbers<[1], [0], [0], [1], [0, 0, 1, 1], [], []>} : vector<16x16xbf16>, vector<16x128xbf16>, vector<16x128xf32> -> vector<16x128xf32>
    %c0_8 = arith.constant 0 : index
    %c0_9 = arith.constant 0 : index
    %c0_10 = arith.constant 0 : index
    %11 = vector.load %arg4[%c0_8, %c0_9, %c0_10] : memref<1x16x1xf32, #tpu.memory_space<vmem>>, vector<1x16x1xf32>
    %12 = vector.shape_cast %11 : vector<1x16x1xf32> to vector<16x1xf32>
    %13 = vector.broadcast %12 : vector<16x1xf32> to vector<16x128xf32>
    %14 = arith.addf %10, %13 : vector<16x128xf32>
    %cst_11 = arith.constant dense<0.000000e+00> : vector<128xf32>
    %15 = vector.multi_reduction <add>, %14, %cst_11 [0] : vector<16x128xf32> to vector<128xf32>
    %16 = vector.shape_cast %15 : vector<128xf32> to vector<1x128xf32>
    %cst_12 = arith.constant 1.600000e+01 : f32
    %17 = vector.broadcast %cst_12 : f32 to vector<1x128xf32>
    %18 = arith.divf %16, %17 : vector<1x128xf32>
    %19 = vector.broadcast %18 : vector<1x128xf32> to vector<16x128xf32>
    %20 = arith.subf %14, %19 : vector<16x128xf32>
    %21 = arith.mulf %20, %20 : vector<16x128xf32>
    %cst_13 = arith.constant dense<0.000000e+00> : vector<128xf32>
    %22 = vector.multi_reduction <add>, %21, %cst_13 [0] : vector<16x128xf32> to vector<128xf32>
    %23 = vector.shape_cast %22 : vector<128xf32> to vector<1x128xf32>
    %cst_14 = arith.constant 1.600000e+01 : f32
    %24 = vector.broadcast %cst_14 : f32 to vector<1x128xf32>
    %25 = arith.divf %23, %24 : vector<1x128xf32>
    %26 = vector.broadcast %18 : vector<1x128xf32> to vector<16x128xf32>
    %27 = arith.subf %14, %26 : vector<16x128xf32>
    %cst_15 = arith.constant 9.99999974E-6 : f32
    %28 = vector.broadcast %cst_15 : f32 to vector<1x128xf32>
    %29 = arith.addf %25, %28 : vector<1x128xf32>
    %30 = math.rsqrt %29 : vector<1x128xf32>
    %31 = vector.broadcast %30 : vector<1x128xf32> to vector<16x128xf32>
    %32 = arith.mulf %27, %31 : vector<16x128xf32>
    %c0_16 = arith.constant 0 : index
    %c0_17 = arith.constant 0 : index
    %c0_18 = arith.constant 0 : index
    %33 = vector.load %arg6[%c0_16, %c0_17, %c0_18] : memref<1x1x128xf32, #tpu.memory_space<vmem>>, vector<1x1x128xf32>
    %34 = vector.shape_cast %33 : vector<1x1x128xf32> to vector<1x128xf32>
    %35 = vector.broadcast %34 : vector<1x128xf32> to vector<16x128xf32>
    %36 = arith.mulf %32, %35 : vector<16x128xf32>
    %c0_19 = arith.constant 0 : index
    %c0_20 = arith.constant 0 : index
    %c0_21 = arith.constant 0 : index
    %37 = vector.load %arg7[%c0_19, %c0_20, %c0_21] : memref<1x1x128xf32, #tpu.memory_space<vmem>>, vector<1x1x128xf32>
    %38 = vector.shape_cast %37 : vector<1x1x128xf32> to vector<1x128xf32>
    %39 = vector.broadcast %38 : vector<1x128xf32> to vector<16x128xf32>
    %40 = arith.addf %36, %39 : vector<16x128xf32>
    %c2_i32 = arith.constant 2 : i32
    %41 = arith.cmpi slt, %arg0, %c2_i32 : i32
    %42 = arith.extui %41 : i1 to i32
    %c0_i32_22 = arith.constant 0 : i32
    %43 = arith.cmpi ne, %42, %c0_i32_22 : i32
    scf.if %43 {
      %cst_26 = arith.constant 0.000000e+00 : f32
      %50 = vector.broadcast %cst_26 : f32 to vector<16x128xf32>
      %51 = arith.maximumf %40, %50 : vector<16x128xf32>
      %c0_27 = arith.constant 0 : index
      %c0_28 = arith.constant 0 : index
      %52 = vector.load %arg16[%c0_27, %c0_28] : memref<16x128xf32, #tpu.memory_space<vmem>>, vector<16x128xf32>
      tpu.vector_store %arg16[%c0_27, %c0_28], %51 {strides = array<i32>} : memref<16x128xf32, #tpu.memory_space<vmem>>, vector<16x128xf32>,
    } else {
    }
    %true = arith.constant true
    %44 = arith.xori %41, %true : i1
    %45 = arith.extui %44 : i1 to i32
    %c0_i32_23 = arith.constant 0 : i32
    %46 = arith.cmpi ne, %45, %c0_i32_23 : i32
    scf.if %46 {
      %c0_26 = arith.constant 0 : index
      %c0_27 = arith.constant 0 : index
      %50 = vector.load %arg16[%c0_26, %c0_27] : memref<16x128xf32, #tpu.memory_space<vmem>>, vector<16x128xf32>
      tpu.vector_store %arg16[%c0_26, %c0_27], %40 {strides = array<i32>} : memref<16x128xf32, #tpu.memory_space<vmem>>, vector<16x128xf32>,
    } else {
    }
    %c2_i32_24 = arith.constant 2 : i32
    %47 = arith.cmpi eq, %arg0, %c2_i32_24 : i32
    %48 = arith.extui %47 : i1 to i32
    %c0_i32_25 = arith.constant 0 : i32
    %49 = arith.cmpi ne, %48, %c0_i32_25 : i32
    scf.if %49 {
      %c0_26 = arith.constant 0 : index
      %c0_27 = arith.constant 0 : index
      %50 = vector.load %arg3[%c0_26, %c0_27] : memref<1x16xi32, #tpu.memory_space<vmem>>, vector<1x16xi32>
      %51 = tpu.iota {dimensions = array<i32: 0>} : vector<2x16xi32>
      %52 = vector.broadcast %50 : vector<1x16xi32> to vector<2x16xi32>
      %53 = arith.cmpi eq, %52, %51 : vector<2x16xi32>
      %54 = arith.extui %53 : vector<2x16xi1> to vector<2x16xi32>
      %55 = arith.sitofp %54 : vector<2x16xi32> to vector<2x16xf32>
      %cst_28 = arith.constant dense<0.000000e+00> : vector<2xf32>
      %56 = vector.multi_reduction <add>, %55, %cst_28 [1] : vector<2x16xf32> to vector<2xf32>
      %57 = vector.shape_cast %56 : vector<2xf32> to vector<2x1xf32>
      %c0_29 = arith.constant 0 : index
      %c0_30 = arith.constant 0 : index
      %58 = vector.load %arg16[%c0_29, %c0_30] : memref<16x128xf32, #tpu.memory_space<vmem>>, vector<16x128xf32>
      %cst_31 = arith.constant dense<0.000000e+00> : vector<2x128xf32>
      %59 = tpu.matmul %55, %58, %cst_31 {dimension_numbers = #tpu.dot_dimension_numbers<[1], [0], [0], [1], [0, 0, 1, 1], [], []>} : vector<2x16xf32>, vector<16x128xf32>, vector<2x128xf32> -> vector<2x128xf32>
      %cst_32 = arith.constant 1.000000e+00 : f32
      %60 = vector.broadcast %cst_32 : f32 to vector<2x1xf32>
      %61 = arith.maximumf %57, %60 : vector<2x1xf32>
      %62 = vector.broadcast %61 : vector<2x1xf32> to vector<2x128xf32>
      %63 = arith.divf %59, %62 : vector<2x128xf32>
      %c0_33 = arith.constant 0 : index
      %c0_34 = arith.constant 0 : index
      %64 = vector.load %arg8[%c0_33, %c0_34] : memref<128x128xf32, #tpu.memory_space<vmem>>, vector<128x128xf32>
      %cst_35 = arith.constant dense<0.000000e+00> : vector<2x128xf32>
      %65 = tpu.matmul %63, %64, %cst_35 {dimension_numbers = #tpu.dot_dimension_numbers<[1], [0], [0], [1], [0, 0, 1, 1], [], []>} : vector<2x128xf32>, vector<128x128xf32>, vector<2x128xf32> -> vector<2x128xf32>
      %c0_36 = arith.constant 0 : index
      %c0_37 = arith.constant 0 : index
      %66 = vector.load %arg9[%c0_36, %c0_37] : memref<1x128xf32, #tpu.memory_space<vmem>>, vector<1x128xf32>
      %67 = vector.broadcast %66 : vector<1x128xf32> to vector<2x128xf32>
      %68 = arith.addf %65, %67 : vector<2x128xf32>
      %c0_38 = arith.constant 0 : index
      %c0_39 = arith.constant 0 : index
      %69 = vector.load %arg10[%c0_38, %c0_39] : memref<128x64xf32, #tpu.memory_space<vmem>>, vector<128x64xf32>
      %cst_40 = arith.constant dense<0.000000e+00> : vector<2x64xf32>
      %70 = tpu.matmul %68, %69, %cst_40 {dimension_numbers = #tpu.dot_dimension_numbers<[1], [0], [0], [1], [0, 0, 1, 1], [], []>} : vector<2x128xf32>, vector<128x64xf32>, vector<2x64xf32> -> vector<2x64xf32>
      %c0_41 = arith.constant 0 : index
      %c0_42 = arith.constant 0 : index
      %71 = vector.load %arg11[%c0_41, %c0_42] : memref<1x64xf32, #tpu.memory_space<vmem>>, vector<1x64xf32>
      %72 = vector.broadcast %71 : vector<1x64xf32> to vector<2x64xf32>
      %73 = arith.addf %70, %72 : vector<2x64xf32>
      %cst_43 = arith.constant 2.000000e+01 : f32
      %74 = vector.broadcast %cst_43 : f32 to vector<2x64xf32>
      %75 = arith.cmpf ogt, %73, %74 : vector<2x64xf32>
      %cst_44 = arith.constant 2.000000e+01 : f32
      %76 = vector.broadcast %cst_44 : f32 to vector<2x64xf32>
      %77 = arith.minimumf %73, %76 : vector<2x64xf32>
      %78 = math.exp %77 : vector<2x64xf32>
      %cst_45 = arith.constant 1.000000e+00 : f32
      %79 = vector.broadcast %cst_45 : f32 to vector<2x64xf32>
      %80 = arith.addf %79, %78 : vector<2x64xf32>
      %81 = math.log %80 : vector<2x64xf32>
      %82 = arith.select %75, %73, %81 : vector<2x64xi1>, vector<2x64xf32>
      %c0_46 = arith.constant 0 : index
      %c0_47 = arith.constant 0 : index
      %83 = vector.load %arg12[%c0_46, %c0_47] : memref<64x2xf32, #tpu.memory_space<vmem>>, vector<64x2xf32>
      %cst_48 = arith.constant dense<0.000000e+00> : vector<2x2xf32>
      %84 = tpu.matmul %82, %83, %cst_48 {dimension_numbers = #tpu.dot_dimension_numbers<[1], [0], [0], [1], [0, 0, 1, 1], [], []>} : vector<2x64xf32>, vector<64x2xf32>, vector<2x2xf32> -> vector<2x2xf32>
      %c0_49 = arith.constant 0 : index
      %c0_50 = arith.constant 0 : index
      %85 = vector.load %arg13[%c0_49, %c0_50] : memref<1x2xf32, #tpu.memory_space<vmem>>, vector<1x2xf32>
      %86 = vector.broadcast %85 : vector<1x2xf32> to vector<2x2xf32>
      %87 = arith.addf %84, %86 : vector<2x2xf32>
      %c0_51 = arith.constant 0 : index
      %c0_52 = arith.constant 0 : index
      %88 = vector.load %arg14[%c0_51, %c0_52] : memref<2x128xf32, #tpu.memory_space<vmem>>, vector<2x128xf32>
      tpu.vector_store %arg14[%c0_51, %c0_52], %68 {strides = array<i32>} : memref<2x128xf32, #tpu.memory_space<vmem>>, vector<2x128xf32>,
      %c0_53 = arith.constant 0 : index
      %c0_54 = arith.constant 0 : index
      %89 = vector.load %arg15[%c0_53, %c0_54] : memref<2x2xf32, #tpu.memory_space<vmem>>, vector<2x2xf32>
      tpu.vector_store %arg15[%c0_53, %c0_54], %87 {strides = array<i32>} : memref<2x2xf32, #tpu.memory_space<vmem>>, vector<2x2xf32>,
    } else {
    }
    return
  }
  func.func @transform_0(%arg0: i32) -> (i32, i32) {
    %c0_i32 = arith.constant 0 : i32
    %c0_i32_0 = arith.constant 0 : i32
    %c0_i32_1 = arith.constant 0 : i32
    return %c0_i32, %c0_i32_0 : i32, i32
  }
  func.func @transform_1(%arg0: i32) -> (i32, i32) {
    %c0_i32 = arith.constant 0 : i32
    %c0_i32_0 = arith.constant 0 : i32
    %c0_i32_1 = arith.constant 0 : i32
    return %c0_i32, %c0_i32_0 : i32, i32
  }
  func.func @transform_2(%arg0: i32) -> (i32, i32) {
    %c0_i32 = arith.constant 0 : i32
    %c0_i32_0 = arith.constant 0 : i32
    %c0_i32_1 = arith.constant 0 : i32
    return %c0_i32, %c0_i32_0 : i32, i32
  }
  func.func @transform_3(%arg0: i32) -> (i32, i32, i32) {
    %c0_i32 = arith.constant 0 : i32
    %c0_i32_0 = arith.constant 0 : i32
    %c0_i32_1 = arith.constant 0 : i32
    return %arg0, %c0_i32, %c0_i32_0 : i32, i32, i32
  }
  func.func @transform_4(%arg0: i32) -> (i32, i32, i32) {
    %c0_i32 = arith.constant 0 : i32
    %c0_i32_0 = arith.constant 0 : i32
    %c0_i32_1 = arith.constant 0 : i32
    return %arg0, %c0_i32, %c0_i32_0 : i32, i32, i32
  }
  func.func @transform_5(%arg0: i32) -> (i32, i32, i32) {
    %c0_i32 = arith.constant 0 : i32
    %c0_i32_0 = arith.constant 0 : i32
    %c0_i32_1 = arith.constant 0 : i32
    return %arg0, %c0_i32, %c0_i32_0 : i32, i32, i32
  }
  func.func @transform_6(%arg0: i32) -> (i32, i32, i32) {
    %c0_i32 = arith.constant 0 : i32
    %c0_i32_0 = arith.constant 0 : i32
    %c0_i32_1 = arith.constant 0 : i32
    return %arg0, %c0_i32, %c0_i32_0 : i32, i32, i32
  }
  func.func @transform_7(%arg0: i32) -> (i32, i32) {
    %c0_i32 = arith.constant 0 : i32
    %c0_i32_0 = arith.constant 0 : i32
    %c0_i32_1 = arith.constant 0 : i32
    return %c0_i32, %c0_i32_0 : i32, i32
  }
  func.func @transform_8(%arg0: i32) -> (i32, i32) {
    %c0_i32 = arith.constant 0 : i32
    %c0_i32_0 = arith.constant 0 : i32
    %c0_i32_1 = arith.constant 0 : i32
    return %c0_i32, %c0_i32_0 : i32, i32
  }
  func.func @transform_9(%arg0: i32) -> (i32, i32) {
    %c0_i32 = arith.constant 0 : i32
    %c0_i32_0 = arith.constant 0 : i32
    %c0_i32_1 = arith.constant 0 : i32
    return %c0_i32, %c0_i32_0 : i32, i32
  }
  func.func @transform_10(%arg0: i32) -> (i32, i32) {
    %c0_i32 = arith.constant 0 : i32
    %c0_i32_0 = arith.constant 0 : i32
    %c0_i32_1 = arith.constant 0 : i32
    return %c0_i32, %c0_i32_0 : i32, i32
  }
  func.func @transform_11(%arg0: i32) -> (i32, i32) {
    %c0_i32 = arith.constant 0 : i32
    %c0_i32_0 = arith.constant 0 : i32
    %c0_i32_1 = arith.constant 0 : i32
    return %c0_i32, %c0_i32_0 : i32, i32
  }
  func.func @transform_12(%arg0: i32) -> (i32, i32) {
    %c0_i32 = arith.constant 0 : i32
    %c0_i32_0 = arith.constant 0 : i32
    %c0_i32_1 = arith.constant 0 : i32
    return %c0_i32, %c0_i32_0 : i32, i32
  }
  func.func @transform_13(%arg0: i32) -> (i32, i32) {
    %c0_i32 = arith.constant 0 : i32
    %c0_i32_0 = arith.constant 0 : i32
    %c0_i32_1 = arith.constant 0 : i32
    return %c0_i32, %c0_i32_0 : i32, i32
  }
  func.func @transform_14(%arg0: i32) -> (i32, i32) {
    %c0_i32 = arith.constant 0 : i32
    %c0_i32_0 = arith.constant 0 : i32
    %c0_i32_1 = arith.constant 0 : i32
    return %c0_i32, %c0_i32_0 : i32, i32
  }
}

</mosaic_0001>

<bundles_post_ra>
// kernel: tpu_custom_call.1
= control target key start
LH: loop header
LB: loop body
LE: loop exit
PB: predicated region body
PF: predicated region fallthrough
CT: control target
= control target key end

     0   :  { %s3191_s0 = inlined_call_operand.hbm [shape: bf16[16,16], index: 0, kind: input, shape index: {}]   ;;  %s3192_s1 = inlined_call_operand.hbm [shape: f32[16,128], index: 1, kind: input, shape index: {}]   ;;  %s3193_s2 = inlined_call_operand.hbm [shape: s32[1,16], index: 2, kind: input, shape index: {}]   ;;  %s3194_s3 = inlined_call_operand.hbm [shape: f32[3,16,1], index: 3, kind: input, shape index: {}]   ;;  %s3195_s4 = inlined_call_operand.hbm [shape: bf16[3,128,128], index: 4, kind: input, shape index: {}]   ;;  %s3196_s5 = inlined_call_operand.hbm [shape: f32[3,1,128], index: 5, kind: input, shape index: {}]   ;;  %s3197_s6 = inlined_call_operand.hbm [shape: f32[3,1,128], index: 6, kind: input, shape index: {}]   ;;  %s3198_s7 = inlined_call_operand.hbm [shape: f32[128,128], index: 7, kind: input, shape index: {}]   ;;  %s3199_s8 = inlined_call_operand.hbm [shape: f32[1,128], index: 8, kind: input, shape index: {}]   ;;  %s3200_s9 = inlined_call_operand.hbm [shape: f32[128,64], index: 9, kind: input, shape index: {}]   ;;  %s3201_s10 = inlined_call_operand.hbm [shape: f32[1,64], index: 10, kind: input, shape index: {}]   ;;  %s3202_s11 = inlined_call_operand.hbm [shape: f32[64,2], index: 11, kind: input, shape index: {}]   ;;  %s3203_s12 = inlined_call_operand.hbm [shape: f32[1,2], index: 12, kind: input, shape index: {}]   ;;  %s3204_s13 = inlined_call_operand.hbm [shape: f32[2,128], index: 13, kind: output, shape index: {0}]   ;;  %s3205_s14 = inlined_call_operand.hbm [shape: f32[2,2], index: 14, kind: output, shape index: {1}]  }
   0x1   :  { %3231 = sst [smem:[#allocation41_spill]] %s3192_s1 }
   0x2   :  { %3232 = sst [smem:[#allocation42_spill]] %s3194_s3 }
   0x3   :  { %3233 = sst [smem:[#allocation43_spill]] %s3195_s4 }
   0x4   :  { %3234 = sst [smem:[#allocation44_spill]] %s3196_s5 }
   0x5   :  { %3235 = sst [smem:[#allocation45_spill]] %s3198_s7 }
   0x6   :  { %3236 = sst [smem:[#allocation46_spill]] %s3200_s9 }
   0x7   :  { %3237 = sst [smem:[#allocation47_spill]] %s3201_s10 }
   0x8   :  { %3238 = sst [smem:[#allocation48_spill]] %s3202_s11 }
   0x9   :  { %3239 = sst [smem:[#allocation49_spill]] %s3203_s12 }
   0xa   :  { %3240 = sst [smem:[#allocation50_spill]] %s3204_s13 }
   0xb   :  { %3241 = sst [smem:[#allocation51_spill]] %s3205_s14 }
   0xc   :  { %20 = vsyncpa [#allocation4], 0 }
   0xd   :  { %21 = vsyncpa [#allocation7], 0 }
   0xe   :  { %22 = vsyncpa [#allocation10], 0 }
   0xf   :  { %24 = vsyncpa [#allocation10 + $0x1], 0 }
  0x10   :  { %25 = vsyncpa [#allocation13], 0 }
  0x11   :  { %27 = vsyncpa [#allocation13 + $0x1], 0 }
  0x12   :  { %28 = vsyncpa [#allocation16], 0 }
  0x13   :  { %29 = vsyncpa [#allocation19], 0 }
  0x14   :  { %30 = vsyncpa [#allocation22], 0 }
  0x15   :  { %31 = vsyncpa [#allocation5], 0 }
  0x16   :  { %32 = vsyncpa [#allocation26], 0  ;;  %s2627_s29 = smov 0   ;;  %s2629_s30 = smov 0  }
  0x17   :  { %s2631_s15 = smov 0   ;;  %s2633_s16 = smov 0  }
  0x18 LB: > { %3242 = sst [smem:[#allocation36_spill]] %s2521_s15  ;;  %s2527_s17 = smov [#allocation6]   ;;  %s2525_s16 = sphi %s2633_s16, %s3290_s16   ;;  %s2521_s15 = sphi %s2631_s15, %s3292_s15   ;;  %s2517_s30 = sphi %s2629_s30, %s3294_s30   ;;  %s2513_s29 = sphi %s2627_s29, %s3293_s29  }
  0x19   : > { %s403_s18 = sshll.u32 %s2527_s17, 4  ;;  %s2648_s19 = sadd.s32 4294967295, %s2525_s16   ;;  %s2654_s18 = int_to_ptr.vmem [resolvable:$true] %s403_s18 }
  0x1a   : > { %p1544_p0 = scmp.ge.s32.totalorder %s2525_s16, 1  ;;  %p3212_p1 = scmp.eq.s32.totalorder %s2648_s19, 0 }
  0x1b   : > { %p378_p2 = scmp.lt.s32.totalorder %s2525_s16, 4  ;;  %s2528_s21 = smov [#allocation15]  }
  0x1c   : > { %s427_s22 = sshll.u32 %s2528_s21, 4  ;;  %s2529_s24 = smov [#allocation18]   ;;  %s2668_s22 = int_to_ptr.vmem [resolvable:$true] %s427_s22 }
  0x1d   : > { %p2656_p4 = pnand %p1544_p0, %p378_p2  ;;  %s451_s25 = sshll.u32 %s2529_s24, 4  ;;  %s2670_s25 = int_to_ptr.vmem [resolvable:$true] %s451_s25 }
  0x1e   : > { %s3246_s1 = sld [smem:[#allocation41_spill]] }
  0x1f   : > { %s3243_s20 = scalar_select %p2656_p4, 1, 0 }
  0x20   : > { %p1900_p5 = pneg %p2656_p4 }
  0x21   : > { %3244 = sst [smem:[#allocation37_spill]] %s3243_s20 }
  0x22   : > { %p2664_p6 = pnand %p1900_p5, %p3212_p1 }
  0x24   : > { %s3245_s23 = scalar_select %p2664_p6, 1, 0 }
  0x25   : > { %s2035_s28 = scalar_lea.hbm %s3246_s1, 256  ;;  %p2680_p8 = pneg %p2664_p6 }
  0x26   : > { %p2036_p7 = scmp.ne.s32.totalorder %s3246_s1, %s2035_s28  ;;  %p2042_p11 = scmp.lt.u32.totalorder %s2035_s28, %s3246_s1 }
  0x27   : > { %s3247_s21 = scalar_select %p2680_p8, 1, 0 }
  0x28   : > { %p2038_p9 = pnand %p2680_p8, %p2036_p7 }
  0x2a   : > { %p2039_p10 = pneg %p2038_p9 }
  0x2c   : > { %p2044_p12 = pnand %p2042_p11, %p2039_p10 }
  0x2e   : > { %2047 = shalt.err (!%p2044_p12)
}
  0x2f   : > { %s2048_s14 = scalar_lea.vmem %s2654_s18, 256  ;;  %p2056_p5 = scmp.lt.s32.totalorder %s2654_s18, %s2654_s18 }
  0x30   : > { %p2049_p13 = scmp.ne.s32.totalorder %s2654_s18, %s2048_s14  ;;  %p2057_p3 = scmp.lt.s32.totalorder %s2048_s14, %s2048_s14 }
  0x32   : > { %p2051_p0 = pnand %p2049_p13, %p2680_p8  ;;  %p2058_p7 = por %p2057_p3, %p2056_p5 }
  0x34   : > { %p2052_p2 = pneg %p2051_p0 }
  0x36   : > { %p2059_p9 = pnand %p2058_p7, %p2052_p2 }
  0x38   : > { %2062 = shalt.err (!%p2059_p9)
}
  0x39   : > { %s3214_s26 = smov 128   ;;  %s3215_s13 = smov 8  }
  0x3a   : > { %1906 = dma.hbm_to_vmem [thread:$0]  (!%p2664_p6), %s3246_s1, 256, %s2654_s18, [#allocation7], %s3214_s26, %s3214_s26, %s3215_s13  }
  0x3b   : > { %s3248_s7 = sld [smem:[#allocation45_spill]] }
  0x41   : > { %s2063_s14 = scalar_lea.hbm %s3248_s7, 2048 }
  0x42   : > { %p2064_p3 = scmp.ne.s32.totalorder %s3248_s7, %s2063_s14  ;;  %p2070_p12 = scmp.lt.u32.totalorder %s2063_s14, %s3248_s7 }
  0x44   : > { %p2066_p10 = pnand %p2064_p3, %p2680_p8 }
  0x46   : > { %p2067_p11 = pneg %p2066_p10 }
  0x48   : > { %p2072_p13 = pnand %p2070_p12, %p2067_p11 }
  0x4a   : > { %2075 = shalt.err (!%p2072_p13)
}
  0x4b   : > { %s2076_s18 = scalar_lea.vmem %s2668_s22, 2048  ;;  %p2084_p7 = scmp.lt.s32.totalorder %s2668_s22, %s2668_s22 }
  0x4c   : > { %p2077_p0 = scmp.ne.s32.totalorder %s2668_s22, %s2076_s18  ;;  %p2085_p9 = scmp.lt.s32.totalorder %s2076_s18, %s2076_s18 }
  0x4e   : > { %p2079_p2 = pnand %p2077_p0, %p2680_p8  ;;  %p2086_p3 = por %p2085_p9, %p2084_p7 }
  0x50   : > { %p2080_p5 = pneg %p2079_p2 }
  0x52   : > { %p2087_p10 = pnand %p2086_p3, %p2080_p5 }
  0x54   : > { %2090 = shalt.err (!%p2087_p10)
}
  0x55   : > { %1912 = dma.hbm_to_vmem [thread:$0]  (!%p2664_p6), %s3248_s7, 2048, %s2668_s22, [#allocation16], %s3214_s26, %s3214_s26, %s3215_s13  }
  0x56   : > { %s3249_s9 = sld [smem:[#allocation46_spill]] }
  0x5c   : > { %s2091_s27 = scalar_lea.hbm %s3249_s9, 2048 }
  0x5d   : > { %p2092_p11 = scmp.ne.s32.totalorder %s3249_s9, %s2091_s27  ;;  %p2098_p0 = scmp.lt.u32.totalorder %s2091_s27, %s3249_s9 }
  0x5f   : > { %p2094_p12 = pnand %p2092_p11, %p2680_p8 }
  0x61   : > { %p2095_p13 = pneg %p2094_p12 }
  0x63   : > { %p2100_p2 = pnand %p2098_p0, %p2095_p13 }
  0x65   : > { %2103 = shalt.err (!%p2100_p2)
}
  0x66   : > { %s2104_s22 = scalar_lea.vmem %s2670_s25, 2048  ;;  %p2112_p3 = scmp.lt.s32.totalorder %s2670_s25, %s2670_s25 }
  0x67   : > { %p2105_p5 = scmp.ne.s32.totalorder %s2670_s25, %s2104_s22  ;;  %p2113_p10 = scmp.lt.s32.totalorder %s2104_s22, %s2104_s22 }
  0x69   : > { %p2107_p7 = pnand %p2105_p5, %p2680_p8  ;;  %p2114_p11 = por %p2113_p10, %p2112_p3 }
  0x6b   : > { %p2108_p9 = pneg %p2107_p7 }
  0x6d   : > { %p2115_p12 = pnand %p2114_p11, %p2108_p9 }
  0x6f   : > { %2118 = shalt.err (!%p2115_p12)
}
  0x70   : > { %1918 = dma.hbm_to_vmem [thread:$0]  (!%p2664_p6), %s3249_s9, 2048, %s2670_s25, [#allocation19], %s3214_s26, %s3214_s26, %s3215_s13  }
  0x71   : > { %s2532_s10 = smov [#allocation21]   ;;  %s3250_s11 = sld [smem:[#allocation48_spill]] }
  0x72   : > { %s475_s12 = sshll.u32 %s2532_s10, 4  ;;  %s476_s12 = int_to_ptr.vmem [resolvable:$true] %s475_s12 }
  0x77   : > { %s2119_s28 = scalar_lea.hbm %s3250_s11, 1024 }
  0x78   : > { %p2120_p13 = scmp.ne.s32.totalorder %s3250_s11, %s2119_s28  ;;  %p2126_p5 = scmp.lt.u32.totalorder %s2119_s28, %s3250_s11 }
  0x7a   : > { %p2122_p0 = pnand %p2120_p13, %p2680_p8 }
  0x7c   : > { %p2123_p2 = pneg %p2122_p0 }
  0x7e   : > { %p2128_p7 = pnand %p2126_p5, %p2123_p2 }
  0x80   : > { %2131 = shalt.err (!%p2128_p7)
}
  0x81   : > { %s2132_s25 = scalar_lea.vmem %s476_s12, 1024  ;;  %p2140_p11 = scmp.lt.s32.totalorder %s476_s12, %s476_s12 }
  0x82   : > { %p2133_p9 = scmp.ne.s32.totalorder %s476_s12, %s2132_s25  ;;  %p2141_p12 = scmp.lt.s32.totalorder %s2132_s25, %s2132_s25 }
  0x84   : > { %p2135_p3 = pnand %p2133_p9, %p2680_p8  ;;  %p2142_p1 = por %p2141_p12, %p2140_p11 }
  0x86   : > { %p2136_p10 = pneg %p2135_p3 }
  0x88   : > { %p2143_p4 = pnand %p2142_p1, %p2136_p10 }
  0x8a   : > { %2146 = shalt.err (!%p2143_p4)
}
  0x8b   : > { %1924 = dma.hbm_to_vmem [thread:$0]  (!%p2664_p6), %s3250_s11, 1024, %s476_s12, [#allocation22], %s3214_s26, %s3214_s26, %s3215_s13  }
  0x8c   : > { %s2778_s10 = sadd.s32 1, %s2525_s16   ;;  %s108_s20 = sadd.s32 1, %s2521_s15 }
  0x8d   : > { %3251 = sst [smem:[#allocation38_spill]] %s2778_s10  ;;  %s105_s27 = ssub.s32 %s2525_s16, %s2778_s10 }
  0x8e   : > { %p115_p1 = scmp.ne.s32.totalorder %s2521_s15, %s2517_s30  ;;  %p106_p4 = scmp.eq.s32.totalorder %s105_s27, 0 }
  0x8f   : > { %p116_p13 = scmp.eq.s32.totalorder %s2525_s16, 0  ;;  %p121_p0 = scmp.ne.s32.totalorder %s2517_s30, %s2513_s29 }
  0x90   : > { %p1950_p2 = scmp.lt.s32.totalorder %s2525_s16, 3  ;;  %p3253_p7 = scmp.eq.s32.totalorder %s2648_s19, 0 }
  0x91   : > { %s2790_s28 = scalar_select %p106_p4, %s2521_s15, %s108_s20  }
  0x92   : > { %p117_p5 = por %p116_p13, %p115_p1  ;;  %p2794_p9 = por %p3253_p7, %p121_p0 }
  0x93   : > { %3252 = sst [smem:[#allocation39_spill]] %s2790_s28  ;;  %s3216_s12 = sand.u32 1, %s2525_s16  }
  0x94   : > { %s3254_s17 = scalar_select %p2794_p9, 1, 0 }
  0x95   : > { %s2800_s24 = sand.u32 1, %s2521_s15   ;;  %s1604_s22 = sshll.u32 %s2525_s16, 8 }
  0x96   : > { %3255 = sst [smem:[#allocation40_spill]] %s3254_s17  ;;  %s1555_s14 = sshll.u32 %s2800_s24, 4 }
  0x97   : > { %s3256_s3 = sld [smem:[#allocation42_spill]]  ;;  %s504_s29 = scalar_lea.vmem [#allocation9], %s1555_s14 }
  0x98   : > { %s511_s20 = sshll.u32 %s504_s29, 4  ;;  %p2811_p3 = pnand %p1950_p2, %p117_p5  ;;  %s2809_s20 = int_to_ptr.vmem [resolvable:$true] %s511_s20 }
  0x99   : > { %s2818_s13 = scalar_lea.sflag [#allocation10], %s3216_s12 }
  0x9a   : > { %s3257_s27 = scalar_select %p2811_p3, 1, 0 }
  0x9b   : > { %p2824_p11 = pneg %p2811_p3 }
  0x9d   : > { %s2807_s4 = scalar_lea.hbm %s3256_s3, %s1604_s22  ;;  %s2152_s29 = scalar_lea.hbm %s3256_s3, 768 }
  0x9e   : > { %s2147_s25 = scalar_lea.hbm %s2807_s4, 256  ;;  %p2153_p4 = scmp.lt.u32.totalorder %s2807_s4, %s3256_s3 }
  0x9f   : > { %p2148_p10 = scmp.ne.s32.totalorder %s2807_s4, %s2147_s25  ;;  %p2154_p13 = scmp.lt.u32.totalorder %s2152_s29, %s2147_s25 }
  0xa0   : > { %s3258_s22 = scalar_select %p2824_p11, 1, 0 }
  0xa1   : > { %p2150_p12 = pnand %p2824_p11, %p2148_p10  ;;  %p2155_p0 = por %p2154_p13, %p2153_p4 }
  0xa2   : > { %p2156_p2 = scmp.lt.u32.totalorder %s2147_s25, %s2807_s4 }
  0xa3   : > { %p2151_p1 = pneg %p2150_p12 }
  0xa4   : > { %p2157_p5 = por %p2156_p2, %p2155_p0 }
  0xa6   : > { %p2158_p7 = pnand %p2157_p5, %p2151_p1 }
  0xa8   : > { %2161 = shalt.err (!%p2158_p7)
}
  0xa9   : > { %s2162_s12 = scalar_lea.vmem %s2809_s20, 256  ;;  %s2533_s14 = smov [#allocation9]  }
  0xaa   : > { %p2163_p10 = scmp.ne.s32.totalorder %s2809_s20, %s2162_s12  ;;  %s2167_s18 = sshll.u32 %s2533_s14, 4  ;;  %s2168_s18 = int_to_ptr.vmem [resolvable:$false] %s2167_s18 }
  0xab   : > { %s2169_s1 = scalar_lea.vmem %s2168_s18, 512  ;;  %p2170_p6 = scmp.lt.s32.totalorder %s2809_s20, %s2168_s18 }
  0xac   : > { %p2165_p12 = pnand %p2163_p10, %p2824_p11  ;;  %p2171_p8 = scmp.lt.s32.totalorder %s2169_s1, %s2162_s12 }
  0xae   : > { %p2166_p9 = pneg %p2165_p12  ;;  %p2172_p4 = por %p2171_p8, %p2170_p6 }
  0xb0   : > { %p2173_p13 = pnand %p2172_p4, %p2166_p9 }
  0xb2   : > { %2176 = shalt.err (!%p2173_p13)
}
  0xb3   : > { %s3259_s26 = smov 8   ;;  %s3260_s25 = smov 128  }
  0xb4   : > { %1931 = dma.hbm_to_vmem [thread:$0]  (!%p2811_p3), %s2807_s4, 256, %s2809_s20, %s2818_s13, %s3260_s25, %s3260_s25, %s3259_s26  }
  0xb5   : > { %s3261_s29 = sshll.u32 %s2525_s16, 4  ;;  %s3262_s5 = sld [smem:[#allocation44_spill]] }
  0xb6   : > { %s545_s1 = scalar_lea.vmem [#allocation12], %s2800_s24  ;;  %s3263_s7 = smov %s3261_s29 }
  0xb7   : > { %s552_s3 = sshll.u32 %s545_s1, 4  ;;  %s2866_s28 = scalar_lea.hbm %s3197_s6, %s3263_s7  ;;  %s2859_s3 = int_to_ptr.vmem [resolvable:$true] %s552_s3 }
  0xb8   : > { %s3264_s4 = sand.u32 1, %s2525_s16  }
  0xb9   : > { %s2870_s20 = scalar_lea.sflag [#allocation13], %s3264_s4 }
  0xbb   : > { %s2856_s18 = scalar_lea.hbm %s3262_s5, %s3261_s29  ;;  %s2182_s14 = scalar_lea.hbm %s3262_s5, 48 }
  0xbc   : > { %s2177_s26 = scalar_lea.hbm %s2856_s18, 16  ;;  %p2183_p1 = scmp.lt.u32.totalorder %s2856_s18, %s3262_s5 }
  0xbd   : > { %p2178_p6 = scmp.ne.s32.totalorder %s2856_s18, %s2177_s26  ;;  %p2184_p0 = scmp.lt.u32.totalorder %s2182_s14, %s2177_s26 }
  0xbe   : > { %p2186_p5 = scmp.lt.u32.totalorder %s2177_s26, %s2856_s18 }
  0xbf   : > { %p2180_p8 = pnand %p2178_p6, %p2824_p11  ;;  %p2185_p2 = por %p2184_p0, %p2183_p1 }
  0xc1   : > { %p2181_p9 = pneg %p2180_p8  ;;  %p2187_p7 = por %p2186_p5, %p2185_p2 }
  0xc3   : > { %p2188_p10 = pnand %p2187_p7, %p2181_p9 }
  0xc5   : > { %2191 = shalt.err (!%p2188_p10)
}
  0xc6   : > { %s2192_s7 = scalar_lea.vmem %s2859_s3, 16  ;;  %s2534_s9 = smov [#allocation12]  }
  0xc7   : > { %p2193_p12 = scmp.ne.s32.totalorder %s2859_s3, %s2192_s7  ;;  %s2197_s11 = sshll.u32 %s2534_s9, 4  ;;  %s2198_s11 = int_to_ptr.vmem [resolvable:$false] %s2197_s11 }
  0xc8   : > { %s2199_s4 = scalar_lea.vmem %s2198_s11, 32  ;;  %p2200_p6 = scmp.lt.s32.totalorder %s2859_s3, %s2198_s11 }
  0xc9   : > { %p2195_p4 = pnand %p2193_p12, %p2824_p11  ;;  %p2201_p8 = scmp.lt.s32.totalorder %s2199_s4, %s2192_s7 }
  0xcb   : > { %p2196_p13 = pneg %p2195_p4  ;;  %p2202_p1 = por %p2201_p8, %p2200_p6 }
  0xcd   : > { %p2203_p0 = pnand %p2202_p1, %p2196_p13 }
  0xcf   : > { %2206 = shalt.err (!%p2203_p0)
}
  0xd0   : > { %1937 = dma.hbm_to_vmem [thread:$0]  (!%p2811_p3), %s2856_s18, 16, %s2859_s3, %s2870_s20  }
  0xd1   : > { %s2535_s26 = smov [#allocation3]   ;;  %s2207_s12 = scalar_lea.hbm %s3191_s0, 128 }
  0xd2   : > { %s390_s25 = sshll.u32 %s2535_s26, 4  ;;  %p2208_p9 = scmp.ne.s32.totalorder %s3191_s0, %s2207_s12  ;;  %s391_s25 = int_to_ptr.vmem [resolvable:$true] %s390_s25 }
  0xd3   : > { %p3265_p2 = scmp.ne.s32.totalorder %s3247_s21, 0  ;;  %p2214_p10 = scmp.lt.u32.totalorder %s2207_s12, %s3191_s0 }
  0xd5   : > { %p2210_p5 = pnand %p2208_p9, %p3265_p2 }
  0xd7   : > { %p2211_p7 = pneg %p2210_p5 }
  0xd9   : > { %p2216_p12 = pnand %p2214_p10, %p2211_p7 }
  0xdb   : > { %2219 = shalt.err (!%p2216_p12)
}
  0xdc   : > { %s2220_s3 = scalar_lea.vmem %s391_s25, 128  ;;  %p2228_p8 = scmp.lt.s32.totalorder %s391_s25, %s391_s25 }
  0xdd   : > { %p2221_p4 = scmp.ne.s32.totalorder %s391_s25, %s2220_s3  ;;  %p2229_p1 = scmp.lt.s32.totalorder %s2220_s3, %s2220_s3 }
  0xdf   : > { %p2223_p13 = pnand %p2221_p4, %p3265_p2  ;;  %p2230_p0 = por %p2229_p1, %p2228_p8 }
  0xe1   : > { %p2224_p6 = pneg %p2223_p13 }
  0xe3   : > { %p2231_p3 = pnand %p2230_p0, %p2224_p6 }
  0xe5   : > { %2234 = shalt.err (!%p2231_p3)
}
  0xe6   : > { %s2536_s18 = smov 64   ;;  %s2537_s4 = smov 4  }
  0xe7   : > { %p3266_p9 = scmp.ne.s32.totalorder %s3245_s23, 0  ;;  %s2538_s14 = smov [#allocation8]  }
  0xe8   : > { %s417_s12 = sshll.u32 %s2538_s14, 4  ;;  %s2539_s1 = smov [#allocation17]   ;;  %s418_s12 = int_to_ptr.vmem [resolvable:$true] %s417_s12 }
  0xe9   : > { %1903 = dma.hbm_to_vmem [thread:$0]  (!%p3266_p9), %s3191_s0, 128, %s391_s25, [#allocation4], %s2536_s18, %s2536_s18, %s2537_s4  }
  0xea   : > { %s441_s9 = sshll.u32 %s2539_s1, 4  ;;  %s2235_s3 = scalar_lea.hbm %s3193_s2, 16  ;;  %s442_s9 = int_to_ptr.vmem [resolvable:$true] %s441_s9 }
  0xeb   : > { %p2236_p3 = scmp.ne.s32.totalorder %s3193_s2, %s2235_s3  ;;  %p2242_p10 = scmp.lt.u32.totalorder %s2235_s3, %s3193_s2 }
  0xed   : > { %p2238_p5 = pnand %p2236_p3, %p3265_p2 }
  0xef   : > { %p2239_p7 = pneg %p2238_p5 }
  0xf1   : > { %p2244_p12 = pnand %p2242_p10, %p2239_p7 }
  0xf3   : > { %2247 = shalt.err (!%p2244_p12)
}
  0xf4   : > { %s2248_s25 = scalar_lea.vmem %s418_s12, 16  ;;  %s2255_s26 = scalar_lea.vmem %s418_s12, 32 }
  0xf5   : > { %p2249_p4 = scmp.ne.s32.totalorder %s418_s12, %s2248_s25  ;;  %p2256_p8 = scmp.lt.s32.totalorder %s418_s12, %s418_s12 }
  0xf6   : > { %p2257_p1 = scmp.lt.s32.totalorder %s2255_s26, %s2248_s25 }
  0xf7   : > { %p2251_p13 = pnand %p2249_p4, %p3265_p2 }
  0xf8   : > { %p2258_p0 = por %p2257_p1, %p2256_p8 }
  0xf9   : > { %p2252_p6 = pneg %p2251_p13 }
  0xfb   : > { %p2259_p11 = pnand %p2258_p0, %p2252_p6 }
  0xfd   : > { %2262 = shalt.err (!%p2259_p11)
}
  0xfe   : > { %1909 = dma.hbm_to_vmem [thread:$0]  (!%p3266_p9), %s3193_s2, 16, %s418_s12, [#allocation7]  }
  0xff   : > { %s2263_s29 = scalar_lea.hbm %s3199_s8, 16 }
 0x100   : > { %p2264_p3 = scmp.ne.s32.totalorder %s3199_s8, %s2263_s29  ;;  %p2270_p11 = scmp.lt.u32.totalorder %s2263_s29, %s3199_s8 }
 0x102   : > { %p2266_p5 = pnand %p2264_p3, %p3265_p2 }
 0x104   : > { %p2267_p7 = pneg %p2266_p5 }
 0x106   : > { %p2272_p10 = pnand %p2270_p11, %p2267_p7 }
 0x108   : > { %2275 = shalt.err (!%p2272_p10)
}
 0x109   : > { %s2276_s3 = scalar_lea.vmem %s442_s9, 16  ;;  %s2283_s12 = scalar_lea.vmem %s442_s9, 32 }
 0x10a   : > { %p2277_p12 = scmp.ne.s32.totalorder %s442_s9, %s2276_s3  ;;  %p2284_p6 = scmp.lt.s32.totalorder %s442_s9, %s442_s9 }
 0x10b   : > { %p2285_p8 = scmp.lt.s32.totalorder %s2283_s12, %s2276_s3 }
 0x10c   : > { %p2279_p4 = pnand %p2277_p12, %p3265_p2 }
 0x10d   : > { %p2286_p1 = por %p2285_p8, %p2284_p6 }
 0x10e   : > { %p2280_p13 = pneg %p2279_p4 }
 0x110   : > { %p2287_p0 = pnand %p2286_p1, %p2280_p13 }
 0x112   : > { %2290 = shalt.err (!%p2287_p0)
}
 0x113   : > { %1915 = dma.hbm_to_vmem [thread:$0]  (!%p3266_p9), %s3199_s8, 16, %s442_s9, [#allocation16]  }
 0x114   : > { %s2540_s5 = smov [#allocation20]   ;;  %s2541_s10 = smov [#allocation23]  }
 0x115   : > { %s465_s15 = sshll.u32 %s2540_s5, 4  ;;  %s489_s17 = sshll.u32 %s2541_s10, 4  ;;  %s466_s15 = int_to_ptr.vmem [resolvable:$true] %s465_s15  ;;  %s490_s17 = int_to_ptr.vmem [resolvable:$true] %s489_s17 }
 0x116   : > { %s3267_s1 = sld [smem:[#allocation47_spill]] }
 0x11c   : > { %s2291_s7 = scalar_lea.hbm %s3267_s1, 16 }
 0x11d   : > { %p2292_p3 = scmp.ne.s32.totalorder %s3267_s1, %s2291_s7  ;;  %p2298_p11 = scmp.lt.u32.totalorder %s2291_s7, %s3267_s1 }
 0x11f   : > { %p2294_p5 = pnand %p2292_p3, %p3265_p2 }
 0x121   : > { %p2295_p7 = pneg %p2294_p5 }
 0x123   : > { %p2300_p10 = pnand %p2298_p11, %p2295_p7 }
 0x125   : > { %2303 = shalt.err (!%p2300_p10)
}
 0x126   : > { %s2304_s9 = scalar_lea.vmem %s466_s15, 16  ;;  %s2311_s26 = scalar_lea.vmem %s466_s15, 32 }
 0x127   : > { %p2305_p12 = scmp.ne.s32.totalorder %s466_s15, %s2304_s9  ;;  %p2312_p6 = scmp.lt.s32.totalorder %s466_s15, %s466_s15 }
 0x128   : > { %p2313_p8 = scmp.lt.s32.totalorder %s2311_s26, %s2304_s9 }
 0x129   : > { %p2307_p4 = pnand %p2305_p12, %p3265_p2 }
 0x12a   : > { %p2314_p1 = por %p2313_p8, %p2312_p6 }
 0x12b   : > { %p2308_p13 = pneg %p2307_p4 }
 0x12d   : > { %p2315_p0 = pnand %p2314_p1, %p2308_p13 }
 0x12f   : > { %2318 = shalt.err (!%p2315_p0)
}
 0x130   : > { %1921 = dma.hbm_to_vmem [thread:$0]  (!%p3266_p9), %s3267_s1, 16, %s466_s15, [#allocation19]  }
 0x131   : > { %s1558_s29 = sshll.u32 %s2800_s24, 6  ;;  %s3268_s11 = sld [smem:[#allocation49_spill]] }
 0x137   : > { %s2319_s3 = scalar_lea.hbm %s3268_s11, 16 }
 0x138   : > { %p2320_p3 = scmp.ne.s32.totalorder %s3268_s11, %s2319_s3  ;;  %p2326_p11 = scmp.lt.u32.totalorder %s2319_s3, %s3268_s11 }
 0x13a   : > { %p2322_p5 = pnand %p2320_p3, %p3265_p2 }
 0x13c   : > { %p2323_p7 = pneg %p2322_p5 }
 0x13e   : > { %p2328_p10 = pnand %p2326_p11, %p2323_p7 }
 0x140   : > { %2331 = shalt.err (!%p2328_p10)
}
 0x141   : > { %s2332_s15 = scalar_lea.vmem %s490_s17, 16  ;;  %s2339_s5 = scalar_lea.vmem %s490_s17, 32 }
 0x142   : > { %p2333_p12 = scmp.ne.s32.totalorder %s490_s17, %s2332_s15  ;;  %p2340_p6 = scmp.lt.s32.totalorder %s490_s17, %s490_s17 }
 0x143   : > { %p2341_p8 = scmp.lt.s32.totalorder %s2339_s5, %s2332_s15 }
 0x144   : > { %p2335_p4 = pnand %p2333_p12, %p3265_p2 }
 0x145   : > { %p2342_p1 = por %p2341_p8, %p2340_p6 }
 0x146   : > { %p2336_p13 = pneg %p2335_p4 }
 0x148   : > { %p2343_p0 = pnand %p2342_p1, %p2336_p13 }
 0x14a   : > { %2346 = shalt.err (!%p2343_p0)
}
 0x14b   : > { %1927 = dma.hbm_to_vmem [thread:$0]  (!%p3266_p9), %s3268_s11, 16, %s490_s17, [#allocation22]  }
 0x14c   : > { %s1605_s7 = sshll.u32 %s2525_s16, 10  ;;  %s3269_s21 = sld [smem:[#allocation43_spill]] }
 0x14d   : > { %s525_s9 = scalar_lea.vmem [#allocation11], %s1558_s29  ;;  %p3270_p3 = scmp.ne.s32.totalorder %s3258_s22, 0 }
 0x14e   : > { %s532_s26 = sshll.u32 %s525_s9, 4  ;;  %s2994_s26 = int_to_ptr.vmem [resolvable:$true] %s532_s26 }
 0x152   : > { %s2992_s25 = scalar_lea.hbm %s3269_s21, %s1605_s7  ;;  %s2352_s15 = scalar_lea.hbm %s3269_s21, 3072 }
 0x153   : > { %s2347_s23 = scalar_lea.hbm %s2992_s25, 1024  ;;  %p2353_p9 = scmp.lt.u32.totalorder %s2992_s25, %s3269_s21 }
 0x154   : > { %p2348_p2 = scmp.ne.s32.totalorder %s2992_s25, %s2347_s23  ;;  %p2354_p11 = scmp.lt.u32.totalorder %s2352_s15, %s2347_s23 }
 0x155   : > { %p2356_p12 = scmp.lt.u32.totalorder %s2347_s23, %s2992_s25 }
 0x156   : > { %p2350_p5 = pnand %p2348_p2, %p3270_p3  ;;  %p2355_p10 = por %p2354_p11, %p2353_p9 }
 0x158   : > { %p2351_p7 = pneg %p2350_p5  ;;  %p2357_p4 = por %p2356_p12, %p2355_p10 }
 0x15a   : > { %p2358_p13 = pnand %p2357_p4, %p2351_p7 }
 0x15c   : > { %2361 = shalt.err (!%p2358_p13)
}
 0x15d   : > { %s2362_s29 = scalar_lea.vmem %s2994_s26, 1024  ;;  %s2542_s14 = smov [#allocation11]  }
 0x15e   : > { %p2363_p6 = scmp.ne.s32.totalorder %s2994_s26, %s2362_s29  ;;  %s2367_s7 = sshll.u32 %s2542_s14, 4  ;;  %s2368_s7 = int_to_ptr.vmem [resolvable:$false] %s2367_s7 }
 0x15f   : > { %s2369_s3 = scalar_lea.vmem %s2368_s7, 2048  ;;  %p2370_p0 = scmp.lt.s32.totalorder %s2994_s26, %s2368_s7 }
 0x160   : > { %p2365_p8 = pnand %p2363_p6, %p3270_p3  ;;  %p2371_p2 = scmp.lt.s32.totalorder %s2369_s3, %s2362_s29 }
 0x162   : > { %p2366_p1 = pneg %p2365_p8  ;;  %p2372_p5 = por %p2371_p2, %p2370_p0 }
 0x164   : > { %p2373_p9 = pnand %p2372_p5, %p2366_p1 }
 0x166   : > { %2376 = shalt.err (!%p2373_p9)
}
 0x167   : > { %p3271_p7 = scmp.ne.s32.totalorder %s3257_s27, 0  ;;  %s562_s12 = scalar_lea.vmem [#allocation14], %s2800_s24 }
 0x168   : > { %s569_s9 = sshll.u32 %s562_s12, 4  ;;  %s2377_s23 = scalar_lea.hbm %s2866_s28, 16  ;;  %s570_s9 = int_to_ptr.vmem [resolvable:$true] %s569_s9 }
 0x169   : > { %1934 = dma.hbm_to_vmem [thread:$0]  (!%p3271_p7), %s2992_s25, 1024, %s2994_s26, %s2818_s13, %s2536_s18, %s2536_s18, %s2537_s4  }
 0x16a   : > { %p2378_p11 = scmp.ne.s32.totalorder %s2866_s28, %s2377_s23  ;;  %s2382_s15 = scalar_lea.hbm %s3197_s6, 48 }
 0x16b   : > { %p2383_p4 = scmp.lt.u32.totalorder %s2866_s28, %s3197_s6  ;;  %p2384_p13 = scmp.lt.u32.totalorder %s2382_s15, %s2377_s23 }
 0x16c   : > { %p2380_p10 = pnand %p2378_p11, %p3270_p3  ;;  %p2386_p8 = scmp.lt.u32.totalorder %s2377_s23, %s2866_s28 }
 0x16d   : > { %p2385_p6 = por %p2384_p13, %p2383_p4 }
 0x16e   : > { %p2381_p12 = pneg %p2380_p10 }
 0x16f   : > { %p2387_p1 = por %p2386_p8, %p2385_p6 }
 0x171   : > { %p2388_p0 = pnand %p2387_p1, %p2381_p12 }
 0x173   : > { %2391 = shalt.err (!%p2388_p0)
}
 0x174   : > { %s2392_s13 = scalar_lea.vmem %s570_s9, 16  ;;  %s2543_s24 = smov [#allocation14]  }
 0x175   : > { %p2393_p2 = scmp.ne.s32.totalorder %s570_s9, %s2392_s13  ;;  %s2397_s18 = sshll.u32 %s2543_s24, 4  ;;  %s2398_s18 = int_to_ptr.vmem [resolvable:$false] %s2397_s18 }
 0x176   : > { %s2399_s4 = scalar_lea.vmem %s2398_s18, 32  ;;  %p2400_p11 = scmp.lt.s32.totalorder %s570_s9, %s2398_s18 }
 0x177   : > { %p2395_p5 = pnand %p2393_p2, %p3270_p3  ;;  %p2401_p10 = scmp.lt.s32.totalorder %s2399_s4, %s2392_s13 }
 0x179   : > { %p2396_p9 = pneg %p2395_p5  ;;  %p2402_p7 = por %p2401_p10, %p2400_p11 }
 0x17b   : > { %p2403_p4 = pnand %p2402_p7, %p2396_p9 }
 0x17d   : > { %2406 = shalt.err (!%p2403_p4)
}
 0x17e   : > { %p3272_p13 = scmp.ne.s32.totalorder %s3257_s27, 0  ;;  %s3273_s25 = sld [smem:[#allocation37_spill]] }
 0x180   : > { %1940 = dma.hbm_to_vmem [thread:$0]  (!%p3272_p13), %s2866_s28, 16, %s570_s9, %s2870_s20  }
 0x184   : > { %p3274_p12 = scmp.ne.s32.totalorder %s3273_s25, 0 }
 0x185   : > { %p3275_p3 = scmp.eq.s32.totalorder (!%p3274_p12), %s2648_s19, 0 }
 0x186   : > { %578 = sbr.rel (%p3274_p12) target bundleno = 1921 (0x781), region = 72 }
 0x18d   : > { %2476 = dma.done.wait (%p3275_p3), [#allocation4], 128   ;;  %p3276_p6 = pmov %p3275_p3 }
 0x18e   : > { %p3277_p8 = pmov %p3275_p3 }
 0x18f   : > { %2478 = vsyncadd (%p3276_p6), [#allocation4], 4294967168 }
 0x190   : > { %2480 = dma.done.wait (%p3277_p8), [#allocation7], 272   ;;  %p3278_p7 = pmov %p3275_p3 }
 0x191   : > { %s3279_s27 = sld [smem:[#allocation40_spill]]  ;;  %s592_s22 = sand.u32 1, %s2648_s19  }
 0x192   : > { %2482 = vsyncadd (%p3278_p7), [#allocation7], 4294967024  ;;  %s3052_s28 = sand.u32 1, %s2517_s30   ;;  %s593_s26 = scalar_lea.sflag [#allocation10], %s592_s22 }
 0x193   : > { %s1567_s20 = sshll.u32 %s3052_s28, 4 }
 0x194   : > { %s3055_s29 = scalar_lea.vmem [#allocation9], %s1567_s20 }
 0x197   : > { %p3280_p1 = scmp.ne.s32.totalorder %s3279_s27, 0 }
 0x199   : > { %2484 = dma.done.wait (%p3280_p1), %s593_s26, 1280  }
 0x19a   : > { %2486 = vsyncadd (%p3280_p1), %s593_s26, 4294966016  ;;  %s1568_s14 = sshll.u32 %s3052_s28, 6  ;;  %s611_s3 = scalar_lea.sflag [#allocation13], %s592_s22 }
 0x19b   : > { %s3062_s7 = scalar_lea.vmem [#allocation11], %s1568_s14  ;;  %s613_s12 = scalar_lea.vmem [#allocation12], %s3052_s28 }
 0x19c   : > { %2488 = dma.done.wait (%p3280_p1), %s611_s3, 32  }
 0x19d   : > { %2490 = vsyncadd (%p3280_p1), %s611_s3, 4294967264  ;;  %s621_s9 = scalar_lea.vmem [#allocation14], %s3052_s28  ;;  %p3281_p0 = pmov %p3275_p3 }
 0x19f   : > { %2492 = dma.done.wait (%p3281_p0), [#allocation16], 2064   ;;  %p3282_p2 = pmov %p3281_p0 }
 0x1a0   : > { %p3283_p5 = pmov %p3281_p0 }
 0x1a1   : > { %2494 = vsyncadd (%p3282_p2), [#allocation16], 4294965232 }
 0x1a2   : > { %2496 = dma.done.wait (%p3283_p5), [#allocation19], 2064   ;;  %p3284_p9 = pmov %p3281_p0 }
 0x1a3   : > { %p3285_p11 = pmov %p3281_p0 }
 0x1a4   : > { %2498 = vsyncadd (%p3284_p9), [#allocation19], 4294965232 }
 0x1a5   : > { %2500 = dma.done.wait (%p3285_p11), [#allocation22], 1040   ;;  %p3286_p10 = pmov %p3281_p0 }
 0x1a6   : > { %p3287_p4 = scmp.ne.s32.totalorder %s2648_s19, 0 }
 0x1a7   : > { %2502 = vsyncadd (%p3286_p10), [#allocation22], 4294966256  ;;  %v703_v0 = vld [vmem:[#allocation6] sm:$0xff] (!%p3287_p4)  ;;  %v704_v1 = vld [vmem:[#allocation6 + $0x8] sm:$0xff] (!%p3287_p4) }
 0x1a8   : > { %702 = sbr.rel (%p3287_p4) target bundleno = 431 (0x1af), region = 128  ;;  %705 = vst [vmem:[#allocation2] sm:$0xff] (!%p3287_p4), %v703_v0  ;;  %706 = vst [vmem:[#allocation2 + $0x8] sm:$0xff] (!%p3287_p4), %v704_v1 }
 0x1af PF: > { %v2018_v2 = vld [vmem:[%s3062_s7] sm:$0xff]   ;;  %v2544_v3 = vmov 0.0   ;;  %v2019_v4 = vld [vmem:[%s3062_s7 + $0x8] sm:$0xff]   ;;  %vm2545_vm0 = vmmov 0   ;;  %v2020_v5 = vld [vmem:[%s3062_s7 + $0x10] sm:$0xff]   ;;  %v2546_v15 = vmov 0  }
 0x1b0   : > { %1663 = vmatprep.subr.bf16.mxu0 %v2544_v3  ;;  %1683 = vmatprep.subr.bf16.mxu1 %v2544_v3  ;;  %v2021_v6 = vld [vmem:[%s3062_s7 + $0x18] sm:$0xff]   ;;  %v2022_v7 = vld [vmem:[%s3062_s7 + $0x20] sm:$0xff]   ;;  %v2023_v8 = vld [vmem:[%s3062_s7 + $0x28] sm:$0xff]   ;;  %vm835_vm1 = vcmask 130048   ;;  %p1588_p13 = scmp.ge.s32.totalorder %s2648_s19, 2 }
 0x1b1   : > { %1664 = vmatpush3.bf16.msra.mxu0 %v2018_v2  ;;  %1679 = vmatprep.mubr.msk.bf16.mxu0 %vm2545_vm0, %v2544_v3  ;;  %v2024_v9 = vld [vmem:[%s3062_s7 + $0x30] sm:$0xff]   ;;  %v2025_v10 = vld [vmem:[%s3062_s7 + $0x38] sm:$0xff]   ;;  %v2026_v22 = vld [vmem:[#allocation3] sm:$0xff]  }
 0x1b2   : > { %1665 = vmatprep.subr.bf16.mxu0 %v2544_v3  ;;  %1685 = vmatprep.mubr.msk.bf16.mxu1 %vm2545_vm0, %v2544_v3  ;;  %v707_v11 = vld [vmem:[#allocation2] sm:$0xff]  ;;  %v708_v12 = vld [vmem:[#allocation2 + $0x8] sm:$0xff] }
 0x1b3   : > { %v709_v13 = vpack.c.bf16 %v708_v12, %v707_v11  ;;  %v818_v14 = vld [vmem:[%s3055_s29] sm:$0xff]  ;;  %2017 = vset.pattern.permute.xlu0 %v2546_v15  ;;  %v819_v16 = vld [vmem:[%s3055_s29 + $0x8] sm:$0xff] }
 0x1b4   : > { %822 = vperm.xlu0 %2017, %v818_v14   ;;  %v1586_v53 = vld [vmem:[%s613_s12] ss:$0 sm:$0xff] }
 0x1b5   : > { %1666 = vmatpush3.bf16.msra.mxu0 %v2019_v4  ;;  %v1587_v56 = vld [vmem:[%s621_s9] ss:$0 sm:$0xff] }
 0x1b6   : > { %1667 = vmatprep.subr.bf16.mxu0 %v2544_v3 }
 0x1b8   : > { %827 = vperm.xlu0 %2017, %v819_v16  }
 0x1b9   : > { %1668 = vmatpush3.bf16.msra.mxu0 %v2020_v5 }
 0x1ba   : > { %1669 = vmatprep.subr.bf16.mxu0 %v2544_v3 }
 0x1bd   : > { %1670 = vmatpush3.bf16.msra.mxu0 %v2021_v6 }
 0x1be   : > { %1671 = vmatprep.subr.bf16.mxu0 %v2544_v3 }
 0x1c1   : > { %1672 = vmatpush3.bf16.msra.mxu0 %v2022_v7 }
 0x1c2   : > { %1673 = vmatprep.subr.bf16.mxu0 %v2544_v3 }
 0x1c5   : > { %1674 = vmatpush3.bf16.msra.mxu0 %v2023_v8 }
 0x1c6   : > { %1675 = vmatprep.subr.bf16.mxu0 %v2544_v3 }
 0x1c9   : > { %1676 = vmatpush3.bf16.msra.mxu0 %v2024_v9 }
 0x1ca   : > { %1677 = vmatprep.subr.bf16.mxu0 %v2544_v3 }
 0x1cd   : > { %1678 = vmatpush3.bf16.msra.mxu0 %v2025_v10 }
 0x1d0   : > { %1680 = vmatmul.mubr.bf16.vlgmr.msra.gmra.mrb[0].mxu0 %v709_v13 }
 0x233   : > { %v823_v23 = vpop.permute.xlu0 %822 }
 0x237   : > { %v828_v26 = vpop.permute.xlu0 %827 }
 0x2a3   : > { %v808_v17 = vpop.f32.mrb[0].mxu0 }
 0x2a4   : > { %v1681_v18 = vpop.f32.mrb[1].mxu0 }
 0x2a5   : > { %v811_v19 = vpop.f32.mrb[2].mxu0 }
 0x2a6   : > { %v817_v20 = vpack.c.bf16 %v811_v19, %v808_v17  ;;  %v1682_v21 = vpop.f32.mrb[3].mxu0 }
 0x2a8   : > { %1684 = vmatpush3.bf16.msra.mxu1 %v817_v20 }
 0x2ab   : > { %1686 = vmatmul.mubr.msk.bf16.vlgmr.msra.gmra.mrb[0].mxu1 %vm835_vm1, %v2026_v22 }
 0x37e   : > { %v873_v24 = vpop.f32.mrb[0].mxu1 }
 0x37f   : > { %v1687_v25 = vpop.f32.mrb[1].mxu1  ;;  %v874_v28 = vadd.f32 %v873_v24, %v823_v23 }
 0x380   : > { %v876_v27 = vpop.f32.mrb[2].mxu1 }
 0x381   : > { %v877_v29 = vadd.f32 %v876_v27, %v828_v26  ;;  %v1688_v30 = vpop.f32.mrb[3].mxu1 }
 0x383   : > { %v880_v31 = vadd.f32 %v877_v29, %v874_v28 }
 0x385   : > { %v881_v32 = vrot.slane %v880_v31, 4 }
 0x387   : > { %v882_v33 = vadd.f32 %v881_v32, %v880_v31 }
 0x389   : > { %v883_v34 = vrot.slane %v882_v33, 2 }
 0x38b   : > { %v884_v35 = vadd.f32 %v883_v34, %v882_v33 }
 0x38d   : > { %v885_v36 = vrot.slane %v884_v35, 1 }
 0x38f   : > { %v886_v37 = vadd.f32 %v885_v36, %v884_v35 }
 0x391   : > { %v888_v38 = vmul.f32 0.0625, %v886_v37 }
 0x393   : > { %v889_v39 = vsub.f32 %v874_v28, %v888_v38  ;;  %v890_v40 = vsub.f32 %v877_v29, %v888_v38 }
 0x395   : > { %v891_v41 = vmul.f32 %v889_v39, %v889_v39  ;;  %v892_v42 = vmul.f32 %v890_v40, %v890_v40 }
 0x397   : > { %v893_v43 = vadd.f32 %v892_v42, %v891_v41 }
 0x399   : > { %v894_v44 = vrot.slane %v893_v43, 4 }
 0x39b   : > { %v895_v45 = vadd.f32 %v894_v44, %v893_v43 }
 0x39d   : > { %v896_v46 = vrot.slane %v895_v45, 2 }
 0x39f   : > { %v897_v47 = vadd.f32 %v896_v46, %v895_v45 }
 0x3a1   : > { %v898_v48 = vrot.slane %v897_v47, 1 }
 0x3a3   : > { %v899_v49 = vadd.f32 %v898_v48, %v897_v47 }
 0x3a5   : > { %v900_v50 = vmul.f32 0.0625, %v899_v49 }
 0x3a7   : > { %v901_v51 = vadd.f32 1e-05, %v900_v50 }
 0x3a9   : > { %2027 = vrsqrt.f32 %v901_v51 }
 0x3b2   : > { %926 = sbr.rel (%p1588_p13) target bundleno = 957 (0x3bd), region = 132 }
 0x3b3   : > { %v2028_v52 = vpop.eup %2027 }
 0x3b4   : > { %v903_v54 = vmul.f32 %v2028_v52, %v889_v39  ;;  %v904_v55 = vmul.f32 %v2028_v52, %v890_v40 }
 0x3b6   : > { %v912_v57 = vmul.f32 %v1586_v53, %v903_v54  ;;  %v913_v58 = vmul.f32 %v1586_v53, %v904_v55 }
 0x3b8   : > { %v921_v59 = vadd.f32 %v1587_v56, %v912_v57  ;;  %v922_v60 = vadd.f32 %v1587_v56, %v913_v58 }
 0x3ba   : > { %v927_v61 = vmax.f32 %v921_v59, 0.0  ;;  %v928_v62 = vmax.f32 %v922_v60, 0.0 }
 0x3bc   : > { %929 = vst [vmem:[#allocation2] sm:$0xff] %v927_v61  ;;  %930 = vst [vmem:[#allocation2 + $0x8] sm:$0xff] %v928_v62 }
 0x3bd PF: > { %p1589_p12 = scmp.lt.s32.totalorder %s2648_s19, 2 }
 0x3be   : > { %935 = vst [vmem:[#allocation2] sm:$0xff] (!%p1589_p12), %v921_v59  ;;  %936 = vst [vmem:[#allocation2 + $0x8] sm:$0xff] (!%p1589_p12), %v922_v60 }
 0x3bf   : > { %934 = sbr.rel (%p1589_p12) target bundleno = 966 (0x3c6), region = 136 }
 0x3c6 PF: > { %p1590_p3 = scmp.ne.s32.totalorder %s2648_s19, 2 }
 0x3c7   : > { %v955_v63 = vld [vmem:[#allocation2] sm:$0xff] (!%p1590_p3)  ;;  %v956_v0 = vld [vmem:[#allocation2 + $0x8] sm:$0xff] (!%p1590_p3)  ;;  %v942_v1 = vlaneseq (!%p1590_p3)  ;;  %v2547_v3 = vmov (!%p1590_p3), 0.0|0.0   ;;  %vm2548_vm2 = vmmov (!%p1590_p3), 0   ;;  %v2549_v5 = vmov (!%p1590_p3), 0.0   ;;  %v1034_v7 = vld [vmem:[#allocation15 + $0x8] sm:$0xff] (!%p1590_p3) }
 0x3c8   : > { %940 = sbr.rel (%p1590_p3) target bundleno = 1861 (0x745), region = 140  ;;  %v1033_v2 = vld [vmem:[#allocation15] sm:$0xff] (!%p1590_p3)  ;;  %1785 = vmatprep.subr.bf16.mxu0 (!%p1590_p3), %v2547_v3  ;;  %v1786_v4 = vpack.c.bf16 (!%p1590_p3), %v956_v0, %v955_v63  ;;  %1693 = vmatprep.mubr.msk.f32.mxu0 (!%p1590_p3), %vm2548_vm2, %v2549_v5  ;;  %v1591_v6 = vld [vmem:[#allocation8] ss:$0 sm:$0xff] (!%p1590_p3)  ;;  %v1035_v8 = vld [vmem:[#allocation15 + $0x10] sm:$0xff] (!%p1590_p3)  ;;  %vm951_vm3 = vcmask (!%p1590_p3), 123904  }
 0x3c9   : > { %v943_v9 = vshrl.u32 (!%p1590_p3), %v942_v1, 7  ;;  %1788 = vmatprep.subr.bf16.mxu1 (!%p1590_p3), %v2547_v3  ;;  %v1789_v10 = vpack.c.bf16 (!%p1590_p3), %v1034_v7, %v1033_v2  ;;  %v1036_v11 = vld [vmem:[#allocation15 + $0x18] sm:$0xff] (!%p1590_p3)  ;;  %1728 = vmatprep.mubr.msk.f32.mxu1 (!%p1590_p3), %vm2548_vm2, %v2549_v5  ;;  %v1037_v14 = vld [vmem:[#allocation15 + $0x20] sm:$0xff] (!%p1590_p3)  ;;  %v1038_v15 = vld [vmem:[#allocation15 + $0x28] sm:$0xff] (!%p1590_p3)  ;;  %vm1242_vm5 = vcmask (!%p1590_p3), 523264   ;;  %vm1317_vm7 = vcmask (!%p1590_p3), 9216  }
 0x3ca   : > { %1787 = vmatpush3.bf16.msra.mxu0 (!%p1590_p3), %v1786_v4  ;;  %v1792_v12 = vpack.c.bf16 (!%p1590_p3), %v1036_v11, %v1035_v8  ;;  %v1795_v17 = vpack.c.bf16 (!%p1590_p3), %v1038_v15, %v1037_v14  ;;  %v1039_v18 = vld [vmem:[#allocation15 + $0x30] sm:$0xff] (!%p1590_p3)  ;;  %v1040_v19 = vld [vmem:[#allocation15 + $0x38] sm:$0xff] (!%p1590_p3)  ;;  %v1041_v21 = vld [vmem:[#allocation15 + $0x40] sm:$0xff] (!%p1590_p3) }
 0x3cb   : > { %vm948_vm4 = vcmp.eq.s32.totalorder (!%p1590_p3), %v1591_v6, %v943_v9  ;;  %1790 = vmatpush3.bf16.msra.mxu1 (!%p1590_p3), %v1789_v10  ;;  %1812 = vmatprep.subr.bf16.mxu0 (!%p1590_p3), %v2547_v3  ;;  %v1798_v20 = vpack.c.bf16 (!%p1590_p3), %v1040_v19, %v1039_v18  ;;  %v1042_v22 = vld [vmem:[#allocation15 + $0x48] sm:$0xff] (!%p1590_p3)  ;;  %v1043_v23 = vld [vmem:[#allocation15 + $0x50] sm:$0xff] (!%p1590_p3)  ;;  %v1044_v25 = vld [vmem:[#allocation15 + $0x58] sm:$0xff] (!%p1590_p3) }
 0x3cc   : > { %v1592_v13 = vsel (!%p1590_p3), %vm948_vm4, 1.0, %v2549_v5  ;;  %1791 = vmatprep.subr.bf16.mxu1 (!%p1590_p3), %v2547_v3  ;;  %v1801_v24 = vpack.c.bf16 (!%p1590_p3), %v1042_v22, %v1041_v21  ;;  %v1804_v26 = vpack.c.bf16 (!%p1590_p3), %v1044_v25, %v1043_v23  ;;  %v1045_v27 = vld [vmem:[#allocation15 + $0x60] sm:$0xff] (!%p1590_p3)  ;;  %v1046_v28 = vld [vmem:[#allocation15 + $0x68] sm:$0xff] (!%p1590_p3)  ;;  %v1047_v30 = vld [vmem:[#allocation15 + $0x70] sm:$0xff] (!%p1590_p3) }
 0x3cd   : > { %1694 = vmatmul.mubr.msk.f32.vlgmr.msra.gmra.mrb[0].mxu0 (!%p1590_p3), %vm835_vm1, %v1592_v13  ;;  %v952_v16 = vsel (!%p1590_p3), %vm951_vm3, %v1592_v13, 0.0  ;;  %v1807_v29 = vpack.c.bf16 (!%p1590_p3), %v1046_v28, %v1045_v27  ;;  %v1048_v31 = vld [vmem:[#allocation15 + $0x78] sm:$0xff] (!%p1590_p3)  ;;  %v1126_v33 = vld [vmem:[#allocation18] sm:$0xff] (!%p1590_p3)  ;;  %v1127_v34 = vld [vmem:[#allocation18 + $0x8] sm:$0xff] (!%p1590_p3) }
 0x3ce   : > { %953 = vadd.xlane.f32.xlu0 (!%p1590_p3), %v952_v16  ;;  %1763 = vmatprep.mubr.msk.f32.mxu0 (!%p1590_p3), %vm2548_vm2, %v2549_v5  ;;  %v1810_v32 = vpack.c.bf16 (!%p1590_p3), %v1048_v31, %v1047_v30  ;;  %v1128_v35 = vld [vmem:[#allocation18 + $0x10] sm:$0xff] (!%p1590_p3)  ;;  %v1813_v36 = vpack.c.bf16 (!%p1590_p3), %v1127_v34, %v1126_v33  ;;  %v1129_v37 = vld [vmem:[#allocation18 + $0x18] sm:$0xff] (!%p1590_p3)  ;;  %v1130_v39 = vld [vmem:[#allocation18 + $0x20] sm:$0xff] (!%p1590_p3) }
 0x3cf   : > { %1793 = vmatpush3.bf16.msra.mxu1 %v1792_v12  ;;  %v1816_v38 = vpack.c.bf16 %v1129_v37, %v1128_v35  ;;  %v1131_v40 = vld [vmem:[#allocation18 + $0x28] sm:$0xff]  ;;  %v1132_v42 = vld [vmem:[#allocation18 + $0x30] sm:$0xff]  ;;  %v1133_v43 = vld [vmem:[#allocation18 + $0x38] sm:$0xff] }
 0x3d0   : > { %1794 = vmatprep.subr.bf16.mxu1 %v2547_v3  ;;  %1814 = vmatpush3.bf16.msra.mxu0 %v1813_v36  ;;  %v1819_v41 = vpack.c.bf16 %v1131_v40, %v1130_v39  ;;  %v1822_v44 = vpack.c.bf16 %v1133_v43, %v1132_v42  ;;  %v1134_v45 = vld [vmem:[#allocation18 + $0x40] sm:$0xff]  ;;  %v1135_v46 = vld [vmem:[#allocation18 + $0x48] sm:$0xff]  ;;  %v1136_v48 = vld [vmem:[#allocation18 + $0x50] sm:$0xff] }
 0x3d1   : > { %1815 = vmatprep.subr.bf16.mxu0 %v2547_v3  ;;  %v1825_v47 = vpack.c.bf16 %v1135_v46, %v1134_v45  ;;  %v1137_v49 = vld [vmem:[#allocation18 + $0x58] sm:$0xff]  ;;  %v1138_v51 = vld [vmem:[#allocation18 + $0x60] sm:$0xff]  ;;  %v1139_v52 = vld [vmem:[#allocation18 + $0x68] sm:$0xff] }
 0x3d2   : > { %v1828_v50 = vpack.c.bf16 %v1137_v49, %v1136_v48  ;;  %v1831_v53 = vpack.c.bf16 %v1139_v52, %v1138_v51  ;;  %v1140_v60 = vld [vmem:[#allocation18 + $0x70] sm:$0xff]  ;;  %v1141_v61 = vld [vmem:[#allocation18 + $0x78] sm:$0xff]  ;;  %v1227_v4 = vld [vmem:[#allocation21] sm:$0xff] }
 0x3d3   : > { %1796 = vmatpush3.bf16.msra.mxu1 %v1795_v17  ;;  %v1834_v62 = vpack.c.bf16 %v1141_v61, %v1140_v60  ;;  %v1594_v63 = vld [vmem:[#allocation17] ss:$0 sm:$0xff]  ;;  %v1228_v6 = vld [vmem:[#allocation21 + $0x8] sm:$0xff]  ;;  %v1229_v8 = vld [vmem:[#allocation21 + $0x10] sm:$0xff] }
 0x3d4   : > { %1797 = vmatprep.subr.bf16.mxu1 %v2547_v3  ;;  %1817 = vmatpush3.bf16.msra.mxu0 %v1816_v38  ;;  %v1837_v7 = vpack.c.bf16 %v1228_v6, %v1227_v4  ;;  %v1230_v9 = vld [vmem:[#allocation21 + $0x18] sm:$0xff]  ;;  %v1232_v11 = vld [vmem:[#allocation21 + $0x28] sm:$0xff]  ;;  %v1233_v13 = vld [vmem:[#allocation21 + $0x30] sm:$0xff] }
 0x3d5   : > { %1818 = vmatprep.subr.bf16.mxu0 %v2547_v3  ;;  %v1840_v10 = vpack.c.bf16 %v1230_v9, %v1229_v8  ;;  %v1234_v14 = vld [vmem:[#allocation21 + $0x38] sm:$0xff] }
 0x3d6   : > { %v1846_v15 = vpack.c.bf16 %v1234_v14, %v1233_v13  ;;  %v1595_v16 = vld [vmem:[#allocation20] ss:$0 sm:$0xff] }
 0x3d7   : > { %1799 = vmatpush3.bf16.msra.mxu1 %v1798_v20 }
 0x3d8   : > { %1800 = vmatprep.subr.bf16.mxu1 %v2547_v3  ;;  %1820 = vmatpush3.bf16.msra.mxu0 %v1819_v41 }
 0x3d9   : > { %1821 = vmatprep.subr.bf16.mxu0 %v2547_v3 }
 0x3db   : > { %1802 = vmatpush3.bf16.msra.mxu1 %v1801_v24 }
 0x3dc   : > { %1803 = vmatprep.subr.bf16.mxu1 %v2547_v3  ;;  %1823 = vmatpush3.bf16.msra.mxu0 %v1822_v44 }
 0x3dd   : > { %1824 = vmatprep.subr.bf16.mxu0 %v2547_v3 }
 0x3df   : > { %1805 = vmatpush3.bf16.msra.mxu1 %v1804_v26 }
 0x3e0   : > { %1806 = vmatprep.subr.bf16.mxu1 %v2547_v3  ;;  %1826 = vmatpush3.bf16.msra.mxu0 %v1825_v47 }
 0x3e1   : > { %1827 = vmatprep.subr.bf16.mxu0 %v2547_v3 }
 0x3e3   : > { %1808 = vmatpush3.bf16.msra.mxu1 %v1807_v29 }
 0x3e4   : > { %1809 = vmatprep.subr.bf16.mxu1 %v2547_v3  ;;  %1829 = vmatpush3.bf16.msra.mxu0 %v1828_v50 }
 0x3e5   : > { %1830 = vmatprep.subr.bf16.mxu0 %v2547_v3 }
 0x3e7   : > { %1811 = vmatpush3.bf16.msra.mxu1 %v1810_v32 }
 0x3e8   : > { %1836 = vmatprep.subr.bf16.mxu1 %v2547_v3  ;;  %1832 = vmatpush3.bf16.msra.mxu0 %v1831_v53 }
 0x3e9   : > { %1833 = vmatprep.subr.bf16.mxu0 %v2547_v3 }
 0x3ec   : > { %1835 = vmatpush3.bf16.msra.mxu0 %v1834_v62 }
 0x45b   : > { %v954_v54 = vpop.xlane.xlu0 %953 }
 0x45c   : > { %v1030_v55 = vmax.f32 %v954_v54, 1.0 }
 0x45e   : > { %2029 = vrcp.f32 %v1030_v55 }
 0x468   : > { %v2030_v56 = vpop.eup %2029 }
 0x4a0   : > { %v1026_v57 = vpop.f32.mrb[0].mxu0 }
 0x4a1   : > { %v1032_v58 = vmul.f32 %v2030_v56, %v1026_v57  ;;  %v1695_v59 = vpop.f32.mrb[1].mxu0 }
 0x4a3   : > { %1729 = vmatmul.mubr.f32.vlgmr.msra.gmra.mrb[0].mxu1 %v1032_v58 }
 0x4a4   : > { %1782 = vmatprep.mubr.msk.f32.mxu1 %vm2548_vm2, %v2549_v5  ;;  %1838 = vmatpush3.bf16.msra.mxu1 %v1837_v7  ;;  %v1231_v5 = vld [vmem:[#allocation21 + $0x20] sm:$0xff] }
 0x4a5   : > { %1839 = vmatprep.subr.bf16.mxu1 %v2547_v3  ;;  %v1843_v12 = vpack.c.bf16 %v1232_v11, %v1231_v5 }
 0x4a8   : > { %1841 = vmatpush3.bf16.msra.mxu1 %v1840_v10 }
 0x4a9   : > { %1842 = vmatprep.subr.bf16.mxu1 %v2547_v3 }
 0x4ac   : > { %1844 = vmatpush3.bf16.msra.mxu1 %v1843_v12 }
 0x4ad   : > { %1845 = vmatprep.subr.bf16.mxu1 %v2547_v3  ;;  %v1596_v3 = vld [vmem:[#allocation23] ss:$0 sm:$0xff] }
 0x4b0   : > { %1847 = vmatpush3.bf16.msra.mxu1 %v1846_v15 }
 0x576   : > { %v1122_v0 = vpop.f32.mrb[0].mxu1 }
 0x577   : > { %v1123_v1 = vadd.f32 %v1594_v63, %v1122_v0  ;;  %v1730_v2 = vpop.f32.mrb[1].mxu1 }
 0x579   : > { %1316 = vst [vmem:[#allocation24] sm:$0x3] %v1123_v1  ;;  %1764 = vmatmul.mubr.f32.vlgmr.msra.gmra.mrb[2].mxu0 %v1123_v1 }
 0x64c   : > { %v1215_v17 = vpop.f32.mrb[2].mxu0 }
 0x64d   : > { %v1216_v18 = vadd.f32 %v1595_v16, %v1215_v17  ;;  %v1765_v19 = vpop.f32.mrb[3].mxu0 }
 0x64f   : > { %v1220_v20 = vmin.f32 %v1216_v18, 20.0  ;;  %vm1219_vm6 = vcmp.gt.f32.partialorder %v1216_v18, 20.0 }
 0x651   : > { %v1221_v21 = vmul.f32 1.442695, %v1220_v20 }
 0x653   : > { %2031 = vpow2.f32 %v1221_v21 }
 0x65d   : > { %v2032_v22 = vpop.eup %2031 }
 0x65e   : > { %v1223_v23 = vadd.f32 1.0, %v2032_v22 }
 0x660   : > { %2033 = vlog2.f32 %v1223_v23 }
 0x66a   : > { %v2034_v24 = vpop.eup %2033 }
 0x66b   : > { %v1225_v25 = vmul.f32 0.6931472, %v2034_v24 }
 0x66d   : > { %v1226_v26 = vsel %vm1219_vm6, %v1216_v18, %v1225_v25 }
 0x66e   : > { %1783 = vmatmul.mubr.msk.f32.vlgmr.msra.gmra.mrb[2].mxu1 %vm1242_vm5, %v1226_v26 }
 0x741   : > { %v1312_v27 = vpop.f32.mrb[2].mxu1 }
 0x742   : > { %v1313_v28 = vadd.f32 %v1596_v3, %v1312_v27  ;;  %v1784_v29 = vpop.f32.mrb[3].mxu1 }
 0x744   : > { %1318 = vst.msk [vmem:[#allocation25] sm:$0x3] %vm1317_vm7, %v1313_v28 }
 0x745 PF: > { %p1960_p6 = scmp.eq.s32.totalorder %s2648_s19, 2  ;;  %s2550_s23 = smov [#allocation24]  }
 0x746   : > { %s1326_s17 = sshll.u32 %s2550_s23, 4  ;;  %s2551_s16 = smov [#allocation25]   ;;  %s1327_s17 = int_to_ptr.vmem [resolvable:$true] %s1326_s17 }
 0x747   : > { %s1337_s15 = sshll.u32 %s2551_s16, 4  ;;  %s2407_s5 = scalar_lea.vmem %s1327_s17, 32  ;;  %s1338_s15 = int_to_ptr.vmem [resolvable:$true] %s1337_s15 }
 0x748   : > { %p2408_p8 = scmp.ne.s32.totalorder %s1327_s17, %s2407_s5  ;;  %p2414_p0 = scmp.lt.s32.totalorder %s1327_s17, %s1327_s17 }
 0x749   : > { %p2415_p2 = scmp.lt.s32.totalorder %s2407_s5, %s2407_s5 }
 0x74a   : > { %p2409_p7 = pnand %p2408_p8, %p1960_p6 }
 0x74b   : > { %p2416_p5 = por %p2415_p2, %p2414_p0 }
 0x74c   : > { %p2410_p1 = pneg %p2409_p7 }
 0x74e   : > { %p2417_p9 = pnand %p2416_p5, %p2410_p1 }
 0x750   : > { %2420 = shalt.err (!%p2417_p9)
}
 0x751   : > { %s3288_s24 = sld [smem:[#allocation50_spill]] }
 0x757   : > { %s2421_s18 = scalar_lea.hbm %s3288_s24, 32 }
 0x758   : > { %p2422_p11 = scmp.ne.s32.totalorder %s3288_s24, %s2421_s18  ;;  %p2427_p13 = scmp.lt.u32.totalorder %s2421_s18, %s3288_s24 }
 0x75a   : > { %p2423_p10 = pnand %p2422_p11, %p1960_p6 }
 0x75c   : > { %p2424_p4 = pneg %p2423_p10 }
 0x75e   : > { %p2429_p12 = pnand %p2427_p13, %p2424_p4 }
 0x760   : > { %2432 = shalt.err (!%p2429_p12)
}
 0x761   : > { %1893 = dma.vmem_to_hbm [thread:$0]  (%p1960_p6), %s1327_s17, 32, %s3288_s24, [#allocation5]  }
 0x762   : > { %s2433_s26 = scalar_lea.vmem %s1338_s15, 32  ;;  %p2440_p1 = scmp.lt.s32.totalorder %s1338_s15, %s1338_s15 }
 0x763   : > { %p2434_p3 = scmp.ne.s32.totalorder %s1338_s15, %s2433_s26  ;;  %p2441_p0 = scmp.lt.s32.totalorder %s2433_s26, %s2433_s26 }
 0x765   : > { %p2435_p8 = pnand %p2434_p3, %p1960_p6  ;;  %p2442_p2 = por %p2441_p0, %p2440_p1 }
 0x767   : > { %p2436_p7 = pneg %p2435_p8 }
 0x769   : > { %p2443_p5 = pnand %p2442_p2, %p2436_p7 }
 0x76b   : > { %2446 = shalt.err (!%p2443_p5)
}
 0x76c   : > { %s3289_s7 = sld [smem:[#allocation51_spill]] }
 0x772   : > { %s2447_s3 = scalar_lea.hbm %s3289_s7, 32 }
 0x773   : > { %p2448_p9 = scmp.ne.s32.totalorder %s3289_s7, %s2447_s3  ;;  %p2453_p4 = scmp.lt.u32.totalorder %s2447_s3, %s3289_s7 }
 0x775   : > { %p2449_p11 = pnand %p2448_p9, %p1960_p6 }
 0x777   : > { %p2450_p10 = pneg %p2449_p11 }
 0x779   : > { %p2455_p13 = pnand %p2453_p4, %p2450_p10 }
 0x77b   : > { %2458 = shalt.err (!%p2455_p13)
}
 0x77c   : > { %1895 = dma.vmem_to_hbm [thread:$0]  (%p1960_p6), %s1338_s15, 32, %s3289_s7, [#allocation26]  }
 0x77d   : > { %2504 = dma.done.wait (%p1960_p6), [#allocation5], 32  }
 0x77e   : > { %2506 = vsyncadd (%p1960_p6), [#allocation5], 4294967264 }
 0x77f   : > { %2508 = dma.done.wait (%p1960_p6), [#allocation26], 32  }
 0x780   : > { %2510 = vsyncadd (%p1960_p6), [#allocation26], 4294967264 }
 0x781 PF: > { %s3290_s16 = sld [smem:[#allocation38_spill]]  ;;  %s3291_s10 = sld [smem:[#allocation36_spill]] }
 0x782   : > { %s3292_s15 = sld [smem:[#allocation39_spill]]  ;;  %s3293_s29 = smov %s2517_s30 }
 0x787   : > { %p35_p12 = scmp.ge.s32.totalorder %s3290_s16, 5   ;;  %s3294_s30 = smov %s3291_s10 }
 0x789   :  { %37 = sbr.rel (!%p35_p12) target bundleno = 24 (0x18), region = 205 }
 0x790   :  { %1354 = vsyncpa [#allocation4], 1 }
 0x791   :  { %1356 = vsyncpa [#allocation4 + $0x1], 1 }
 0x792   :  { %1357 = vsyncpa [#allocation7], 1 }
 0x793   :  { %1358 = vsyncpa [#allocation10], 1 }
 0x794   :  { %1360 = vsyncpa [#allocation10 + $0x1], 1 }
 0x795   :  { %1361 = vsyncpa [#allocation13], 1 }
 0x796   :  { %1363 = vsyncpa [#allocation13 + $0x1], 1 }
 0x797   :  { %1364 = vsyncpa [#allocation16], 1 }
 0x798   :  { %1365 = vsyncpa [#allocation19], 1 }
 0x799   :  { %1366 = vsyncpa [#allocation22], 1 }
 0x79a   :  { %1367 = vsyncpa [#allocation5], 1 }
 0x79b   :  { %1369 = vsyncpa [#allocation5 + $0x1], 1 }
 0x79c   :  { %1370 = vsyncpa [#allocation26], 1 }

</bundles_post_ra>
